<compile_context>
chip_gen: v5e
topology: v5e:2x2
jax: 0.10.0
libtpu: 0.0.40
codegen_flags: <defaults>
</compile_context>

<pallas_src>
import jax
import jax.numpy as jnp
from jax import lax
from jax.experimental import pallas as pl
from jax.experimental.pallas import tpu as pltpu


def _gates_to_hc(gates, c, H):
    """LSTM gate combine. gates: (B, 4H) pre-activations in (i, f, o, g) column order."""
    sg = jax.nn.sigmoid(gates[:, 0:3 * H])      # i, f, o in one contiguous EUP pass
    g = jnp.tanh(gates[:, 3 * H:4 * H])         # g only
    i = sg[:, 0 * H:1 * H]
    f = sg[:, 1 * H:2 * H]
    o = sg[:, 2 * H:3 * H]
    c_new = f * c + i * g
    h_new = o * jnp.tanh(c_new)
    return h_new, c_new


def sentiment_rnn_kernel(x_ref, h0_ref, c0_ref,
                         wih1_ref, whh1_ref, b1_ref,
                         wih2_ref, whh2_ref, b2_ref,
                         wfc_ref, bfc_ref,
                         out_ref, hn_ref, cn_ref,
                         xproj_ref):
    T, B, H4 = xproj_ref.shape
    H = H4 // 4

    # ---- Hoisted, loop-invariant work -------------------------------------
    # Layer-1 input projection for all timesteps in one matmul (bias folded in),
    # stored time-major as (T, B, 4H) so the per-step load is a leading-axis index.
    # TODO(synk): cast MXU operands to bf16 (keep f32 accumulate/state) for production.
    xproj = jnp.dot(x_ref[...], wih1_ref[...],
                    preferred_element_type=jnp.float32) + b1_ref[...]   # (T*B, 4H)
    xproj_ref[...] = xproj.reshape(T, B, H4)

    whh1 = whh1_ref[...]                                  # (H, 4H)
    wih2 = wih2_ref[...]                                  # (H, 4H)
    whh2 = whh2_ref[...]                                  # (H, 4H)
    b2 = jnp.broadcast_to(b2_ref[...], (B, H4))           # broadcast once, not per step

    # ---- Serial recurrence over time (state stays in vregs as loop carries) --
    def step(t, carry):
        h1, c1, h2, c2 = carry
        xp = xproj_ref[t]                                  # (B, 4H)
        # layer 1: only the recurrent matmul is on the serial path
        g1 = xp + jnp.dot(h1, whh1, preferred_element_type=jnp.float32)
        h1n, c1n = _gates_to_hc(g1, c1, H)
        # inter-layer dropout: identity (inference mode)
        # layer 2: two MXU dots accumulated in f32 (no VMEM round-trip)
        g2 = (jnp.dot(h1n, wih2, preferred_element_type=jnp.float32)
              + jnp.dot(h2, whh2, preferred_element_type=jnp.float32)
              + b2)
        h2n, c2n = _gates_to_hc(g2, c2, H)
        return h1n, c1n, h2n, c2n

    h1, c1, h2, c2 = lax.fori_loop(
        0, T, step,
        (h0_ref[0], c0_ref[0], h0_ref[1], c0_ref[1]),
        unroll=min(T, 8))

    # ---- Final FC (H -> 1) + sigmoid: VPU multiply + lane reduction ----------
    # (dropout on r_out[:, -1, :] is identity in inference mode)
    # NOTE: valid only because output_size == 1 (wfc is (1, H)); guarded in wrapper.
    logits = jnp.sum(h2 * wfc_ref[...], axis=-1, keepdims=True) + bfc_ref[...]
    out_ref[...] = jax.nn.sigmoid(logits)
    hn_ref[0] = h1
    hn_ref[1] = h2
    cn_ref[0] = c1
    cn_ref[1] = c2


def _permute_gate_cols(w, H):
    """Reorder 4H gate columns from PyTorch (i, f, g, o) to (i, f, o, g)."""
    return jnp.concatenate(
        [w[..., 0:2 * H], w[..., 3 * H:4 * H], w[..., 2 * H:3 * H]], axis=-1)


def sentiment_rnn_forward(x_tokens, hidden, params):
    """x_tokens: (B, T) int32; hidden: (h0, c0), each (n_layers=2, B, H)."""
    h0, c0 = hidden
    emb_table = params["embed"]
    B, T = x_tokens.shape
    E = emb_table.shape[1]
    H = h0.shape[-1]
    assert params["wfc"].shape[0] == 1, "fused FC path assumes output_size == 1"

    # Glue: embedding gather + time-major flatten -> (T*B, E).
    # TODO(synk): for production vocab, keep the table in HBM (pl.ANY) and fuse the
    # gather into the kernel via scalar-prefetched token ids + per-chunk row DMA.
    embeds = jnp.take(emb_table, x_tokens, axis=0)               # (B, T, E)
    embeds_tm = jnp.transpose(embeds, (1, 0, 2)).reshape(T * B, E)

    # Host-side gate-column permutation (i,f,g,o) -> (i,f,o,g) so the kernel's
    # transcendentals run on contiguous slabs (half the EUP volume).
    wih1_p = _permute_gate_cols(params["wih1_t"], H)
    whh1_p = _permute_gate_cols(params["whh1_t"], H)
    b1_p = _permute_gate_cols(params["b1"], H)
    wih2_p = _permute_gate_cols(params["wih2_t"], H)
    whh2_p = _permute_gate_cols(params["whh2_t"], H)
    b2_p = _permute_gate_cols(params["b2"], H)

    vmem = pl.BlockSpec(memory_space=pltpu.MemorySpace.VMEM)

    sig_out, h_n, c_n = pl.pallas_call(
        sentiment_rnn_kernel,
        out_shape=(
            jax.ShapeDtypeStruct((B, 1), jnp.float32),
            jax.ShapeDtypeStruct((2, B, H), jnp.float32),
            jax.ShapeDtypeStruct((2, B, H), jnp.float32),
        ),
        in_specs=[vmem] * 11,
        out_specs=(vmem, vmem, vmem),
        scratch_shapes=[
            pltpu.VMEM((T, B, 4 * H), jnp.float32),   # precomputed layer-1 input proj
        ],
    )(embeds_tm, h0, c0,
      wih1_p, whh1_p, b1_p,
      wih2_p, whh2_p, b2_p,
      params["wfc"], params["bfc"])

    return sig_out, (h_n, c_n)


# ---------------------------- reference & setup ----------------------------

def _lstm_cell_ref(x, h, c, w_ih_t, w_hh_t, b):
    gates = x @ w_ih_t + h @ w_hh_t + b
    H = h.shape[-1]
    i = jax.nn.sigmoid(gates[:, 0 * H:1 * H])
    f = jax.nn.sigmoid(gates[:, 1 * H:2 * H])
    g = jnp.tanh(gates[:, 2 * H:3 * H])
    o = jax.nn.sigmoid(gates[:, 3 * H:4 * H])
    c_new = f * c + i * g
    h_new = o * jnp.tanh(c_new)
    return h_new, c_new


def reference_forward(x_tokens, hidden, params):
    """Pure-JAX reference (PyTorch gate order, unpermuted weights)."""
    h0, c0 = hidden
    embeds = jnp.take(params["embed"], x_tokens, axis=0)  # (B, T, E)
    B, T, E = embeds.shape
    h1, c1 = h0[0], c0[0]
    h2, c2 = h0[1], c0[1]
    for t in range(T):
        x_t = embeds[:, t, :]
        h1, c1 = _lstm_cell_ref(x_t, h1, c1, params["wih1_t"], params["whh1_t"], params["b1"])
        h2, c2 = _lstm_cell_ref(h1, h2, c2, params["wih2_t"], params["whh2_t"], params["b2"])
    logits = h2 @ params["wfc"].T + params["bfc"]
    return jax.nn.sigmoid(logits), (jnp.stack([h1, h2]), jnp.stack([c1, c2]))


def make_params(key, vocab_size, E, H, output_size):
    ks = jax.random.split(key, 9)
    s = 0.1
    return {
        "embed":  s * jax.random.normal(ks[0], (vocab_size, E), jnp.float32),
        "wih1_t": s * jax.random.normal(ks[1], (E, 4 * H), jnp.float32),
        "whh1_t": s * jax.random.normal(ks[2], (H, 4 * H), jnp.float32),
        "b1":     s * jax.random.normal(ks[3], (1, 4 * H), jnp.float32),   # b_ih1 + b_hh1
        "wih2_t": s * jax.random.normal(ks[4], (H, 4 * H), jnp.float32),
        "whh2_t": s * jax.random.normal(ks[5], (H, 4 * H), jnp.float32),
        "b2":     s * jax.random.normal(ks[6], (1, 4 * H), jnp.float32),   # b_ih2 + b_hh2
        "wfc":    s * jax.random.normal(ks[7], (output_size, H), jnp.float32),
        "bfc":    s * jax.random.normal(ks[8], (1, output_size), jnp.float32),
    }


if __name__ == "__main__":
    # Small shapes consistent with the module's forward semantics.
    vocab_size = 64
    embedding_dim = 32
    hidden_dim = 32
    n_layers = 2
    output_size = 1
    batch = 8
    seq = 8

    key = jax.random.PRNGKey(0)
    k_param, k_tok = jax.random.split(key)
    params = make_params(k_param, vocab_size, embedding_dim, hidden_dim, output_size)

    x_tokens = jax.random.randint(k_tok, (batch, seq), 0, vocab_size, dtype=jnp.int32)
    # init_hidden: zeros of shape (n_layers, batch, hidden_dim)
    h0 = jnp.zeros((n_layers, batch, hidden_dim), jnp.float32)
    c0 = jnp.zeros((n_layers, batch, hidden_dim), jnp.float32)

    sig_out, (h_n, c_n) = sentiment_rnn_forward(x_tokens, (h0, c0), params)
    jax.block_until_ready((sig_out, h_n, c_n))

    ref_out, (ref_h, ref_c) = reference_forward(x_tokens, (h0, c0), params)
    assert jnp.allclose(sig_out, ref_out, rtol=1e-4, atol=1e-4)
    assert jnp.allclose(h_n, ref_h, rtol=1e-4, atol=1e-4)
    assert jnp.allclose(c_n, ref_c, rtol=1e-4, atol=1e-4)

    print("KERNEL_OK")
</pallas_src>

<mosaic_0001>
module attributes {stable_mosaic.version = 11 : i64} {
  func.func @sentiment_rnn_kernel(%arg0: memref<64x32xf32, #tpu.memory_space<vmem>>, %arg1: memref<2x8x32xf32, #tpu.memory_space<vmem>>, %arg2: memref<2x8x32xf32, #tpu.memory_space<vmem>>, %arg3: memref<32x128xf32, #tpu.memory_space<vmem>>, %arg4: memref<32x128xf32, #tpu.memory_space<vmem>>, %arg5: memref<1x128xf32, #tpu.memory_space<vmem>>, %arg6: memref<32x128xf32, #tpu.memory_space<vmem>>, %arg7: memref<32x128xf32, #tpu.memory_space<vmem>>, %arg8: memref<1x128xf32, #tpu.memory_space<vmem>>, %arg9: memref<1x32xf32, #tpu.memory_space<vmem>>, %arg10: memref<1x1xf32, #tpu.memory_space<vmem>>, %arg11: memref<8x1xf32, #tpu.memory_space<vmem>>, %arg12: memref<2x8x32xf32, #tpu.memory_space<vmem>>, %arg13: memref<2x8x32xf32, #tpu.memory_space<vmem>>, %arg14: memref<8x8x128xf32, #tpu.memory_space<vmem>>) attributes {dimension_semantics = [], scalar_prefetch = 0 : i64, scratch_operands = 1 : i64, tpu.core_type = #tpu.core_type<tc>} {
    %c0 = arith.constant 0 : index
    %c0_0 = arith.constant 0 : index
    %0 = vector.load %arg0[%c0, %c0_0] : memref<64x32xf32, #tpu.memory_space<vmem>>, vector<64x32xf32>
    %c0_1 = arith.constant 0 : index
    %c0_2 = arith.constant 0 : index
    %1 = vector.load %arg3[%c0_1, %c0_2] : memref<32x128xf32, #tpu.memory_space<vmem>>, vector<32x128xf32>
    %cst = arith.constant dense<0.000000e+00> : vector<64x128xf32>
    %2 = tpu.matmul %0, %1, %cst {dimension_numbers = #tpu.dot_dimension_numbers<[1], [0], [0], [1], [0, 0, 1, 1], [], []>} : vector<64x32xf32>, vector<32x128xf32>, vector<64x128xf32> -> vector<64x128xf32>
    %c0_3 = arith.constant 0 : index
    %c0_4 = arith.constant 0 : index
    %3 = vector.load %arg5[%c0_3, %c0_4] : memref<1x128xf32, #tpu.memory_space<vmem>>, vector<1x128xf32>
    %4 = vector.broadcast %3 : vector<1x128xf32> to vector<64x128xf32>
    %5 = arith.addf %2, %4 : vector<64x128xf32>
    %6 = vector.shape_cast %5 : vector<64x128xf32> to vector<8x8x128xf32>
    %c0_5 = arith.constant 0 : index
    %c0_6 = arith.constant 0 : index
    %c0_7 = arith.constant 0 : index
    %7 = vector.load %arg14[%c0_5, %c0_6, %c0_7] : memref<8x8x128xf32, #tpu.memory_space<vmem>>, vector<8x8x128xf32>
    tpu.vector_store %arg14[%c0_5, %c0_6, %c0_7], %6 {strides = array<i32>} : memref<8x8x128xf32, #tpu.memory_space<vmem>>, vector<8x8x128xf32>,
    %c0_8 = arith.constant 0 : index
    %c0_9 = arith.constant 0 : index
    %8 = vector.load %arg4[%c0_8, %c0_9] : memref<32x128xf32, #tpu.memory_space<vmem>>, vector<32x128xf32>
    %c0_10 = arith.constant 0 : index
    %c0_11 = arith.constant 0 : index
    %9 = vector.load %arg6[%c0_10, %c0_11] : memref<32x128xf32, #tpu.memory_space<vmem>>, vector<32x128xf32>
    %c0_12 = arith.constant 0 : index
    %c0_13 = arith.constant 0 : index
    %10 = vector.load %arg7[%c0_12, %c0_13] : memref<32x128xf32, #tpu.memory_space<vmem>>, vector<32x128xf32>
    %c0_14 = arith.constant 0 : index
    %c0_15 = arith.constant 0 : index
    %11 = vector.load %arg8[%c0_14, %c0_15] : memref<1x128xf32, #tpu.memory_space<vmem>>, vector<1x128xf32>
    %12 = vector.shape_cast %11 : vector<1x128xf32> to vector<1x128xf32>
    %13 = vector.broadcast %12 : vector<1x128xf32> to vector<8x128xf32>
    %c0_16 = arith.constant 0 : index
    %c0_17 = arith.constant 0 : index
    %c0_18 = arith.constant 0 : index
    %14 = vector.load %arg1[%c0_16, %c0_17, %c0_18] : memref<2x8x32xf32, #tpu.memory_space<vmem>>, vector<1x8x32xf32>
    %15 = vector.shape_cast %14 : vector<1x8x32xf32> to vector<8x32xf32>
    %c0_19 = arith.constant 0 : index
    %c0_20 = arith.constant 0 : index
    %c0_21 = arith.constant 0 : index
    %16 = vector.load %arg2[%c0_19, %c0_20, %c0_21] : memref<2x8x32xf32, #tpu.memory_space<vmem>>, vector<1x8x32xf32>
    %17 = vector.shape_cast %16 : vector<1x8x32xf32> to vector<8x32xf32>
    %c1 = arith.constant 1 : index
    %c0_22 = arith.constant 0 : index
    %c0_23 = arith.constant 0 : index
    %18 = vector.load %arg1[%c1, %c0_22, %c0_23] : memref<2x8x32xf32, #tpu.memory_space<vmem>>, vector<1x8x32xf32>
    %19 = vector.shape_cast %18 : vector<1x8x32xf32> to vector<8x32xf32>
    %c1_24 = arith.constant 1 : index
    %c0_25 = arith.constant 0 : index
    %c0_26 = arith.constant 0 : index
    %20 = vector.load %arg2[%c1_24, %c0_25, %c0_26] : memref<2x8x32xf32, #tpu.memory_space<vmem>>, vector<1x8x32xf32>
    %21 = vector.shape_cast %20 : vector<1x8x32xf32> to vector<8x32xf32>
    %c0_i32 = arith.constant 0 : i32
    %22 = arith.index_cast %c0_i32 : i32 to index
    %c0_27 = arith.constant 0 : index
    %c0_28 = arith.constant 0 : index
    %23 = vector.load %arg14[%22, %c0_27, %c0_28] : memref<8x8x128xf32, #tpu.memory_space<vmem>>, vector<1x8x128xf32>
    %24 = vector.shape_cast %23 : vector<1x8x128xf32> to vector<8x128xf32>
    %cst_29 = arith.constant dense<0.000000e+00> : vector<8x128xf32>
    %25 = tpu.matmul %15, %8, %cst_29 {dimension_numbers = #tpu.dot_dimension_numbers<[1], [0], [0], [1], [0, 0, 1, 1], [], []>} : vector<8x32xf32>, vector<32x128xf32>, vector<8x128xf32> -> vector<8x128xf32>
    %26 = arith.addf %24, %25 : vector<8x128xf32>
    %27 = vector.extract_strided_slice %26 {offsets = [0, 0], sizes = [8, 96], strides = [1, 1]} : vector<8x128xf32> to vector<8x96xf32>
    %28 = arith.negf %27 : vector<8x96xf32>
    %29 = math.exp %28 : vector<8x96xf32>
    %cst_30 = arith.constant 1.000000e+00 : f32
    %30 = vector.broadcast %cst_30 : f32 to vector<8x96xf32>
    %31 = arith.addf %30, %29 : vector<8x96xf32>
    %32 = arith.divf %30, %31 : vector<8x96xf32>
    %33 = vector.extract_strided_slice %26 {offsets = [0, 96], sizes = [8, 32], strides = [1, 1]} : vector<8x128xf32> to vector<8x32xf32>
    %34 = math.tanh %33 : vector<8x32xf32>
    %35 = vector.extract_strided_slice %32 {offsets = [0, 0], sizes = [8, 32], strides = [1, 1]} : vector<8x96xf32> to vector<8x32xf32>
    %36 = vector.extract_strided_slice %32 {offsets = [0, 32], sizes = [8, 32], strides = [1, 1]} : vector<8x96xf32> to vector<8x32xf32>
    %37 = vector.extract_strided_slice %32 {offsets = [0, 64], sizes = [8, 32], strides = [1, 1]} : vector<8x96xf32> to vector<8x32xf32>
    %38 = arith.mulf %36, %17 : vector<8x32xf32>
    %39 = arith.mulf %35, %34 : vector<8x32xf32>
    %40 = arith.addf %38, %39 : vector<8x32xf32>
    %41 = math.tanh %40 : vector<8x32xf32>
    %42 = arith.mulf %37, %41 : vector<8x32xf32>
    %cst_31 = arith.constant dense<0.000000e+00> : vector<8x128xf32>
    %43 = tpu.matmul %42, %9, %cst_31 {dimension_numbers = #tpu.dot_dimension_numbers<[1], [0], [0], [1], [0, 0, 1, 1], [], []>} : vector<8x32xf32>, vector<32x128xf32>, vector<8x128xf32> -> vector<8x128xf32>
    %cst_32 = arith.constant dense<0.000000e+00> : vector<8x128xf32>
    %44 = tpu.matmul %19, %10, %cst_32 {dimension_numbers = #tpu.dot_dimension_numbers<[1], [0], [0], [1], [0, 0, 1, 1], [], []>} : vector<8x32xf32>, vector<32x128xf32>, vector<8x128xf32> -> vector<8x128xf32>
    %45 = arith.addf %43, %44 : vector<8x128xf32>
    %46 = arith.addf %45, %13 : vector<8x128xf32>
    %47 = vector.extract_strided_slice %46 {offsets = [0, 0], sizes = [8, 96], strides = [1, 1]} : vector<8x128xf32> to vector<8x96xf32>
    %48 = arith.negf %47 : vector<8x96xf32>
    %49 = math.exp %48 : vector<8x96xf32>
    %cst_33 = arith.constant 1.000000e+00 : f32
    %50 = vector.broadcast %cst_33 : f32 to vector<8x96xf32>
    %51 = arith.addf %50, %49 : vector<8x96xf32>
    %52 = arith.divf %50, %51 : vector<8x96xf32>
    %53 = vector.extract_strided_slice %46 {offsets = [0, 96], sizes = [8, 32], strides = [1, 1]} : vector<8x128xf32> to vector<8x32xf32>
    %54 = math.tanh %53 : vector<8x32xf32>
    %55 = vector.extract_strided_slice %52 {offsets = [0, 0], sizes = [8, 32], strides = [1, 1]} : vector<8x96xf32> to vector<8x32xf32>
    %56 = vector.extract_strided_slice %52 {offsets = [0, 32], sizes = [8, 32], strides = [1, 1]} : vector<8x96xf32> to vector<8x32xf32>
    %57 = vector.extract_strided_slice %52 {offsets = [0, 64], sizes = [8, 32], strides = [1, 1]} : vector<8x96xf32> to vector<8x32xf32>
    %58 = arith.mulf %56, %21 : vector<8x32xf32>
    %59 = arith.mulf %55, %54 : vector<8x32xf32>
    %60 = arith.addf %58, %59 : vector<8x32xf32>
    %61 = math.tanh %60 : vector<8x32xf32>
    %62 = arith.mulf %57, %61 : vector<8x32xf32>
    %c1_i32 = arith.constant 1 : i32
    %63 = arith.index_cast %c1_i32 : i32 to index
    %c0_34 = arith.constant 0 : index
    %c0_35 = arith.constant 0 : index
    %64 = vector.load %arg14[%63, %c0_34, %c0_35] : memref<8x8x128xf32, #tpu.memory_space<vmem>>, vector<1x8x128xf32>
    %65 = vector.shape_cast %64 : vector<1x8x128xf32> to vector<8x128xf32>
    %cst_36 = arith.constant dense<0.000000e+00> : vector<8x128xf32>
    %66 = tpu.matmul %42, %8, %cst_36 {dimension_numbers = #tpu.dot_dimension_numbers<[1], [0], [0], [1], [0, 0, 1, 1], [], []>} : vector<8x32xf32>, vector<32x128xf32>, vector<8x128xf32> -> vector<8x128xf32>
    %67 = arith.addf %65, %66 : vector<8x128xf32>
    %68 = vector.extract_strided_slice %67 {offsets = [0, 0], sizes = [8, 96], strides = [1, 1]} : vector<8x128xf32> to vector<8x96xf32>
    %69 = arith.negf %68 : vector<8x96xf32>
    %70 = math.exp %69 : vector<8x96xf32>
    %cst_37 = arith.constant 1.000000e+00 : f32
    %71 = vector.broadcast %cst_37 : f32 to vector<8x96xf32>
    %72 = arith.addf %71, %70 : vector<8x96xf32>
    %73 = arith.divf %71, %72 : vector<8x96xf32>
    %74 = vector.extract_strided_slice %67 {offsets = [0, 96], sizes = [8, 32], strides = [1, 1]} : vector<8x128xf32> to vector<8x32xf32>
    %75 = math.tanh %74 : vector<8x32xf32>
    %76 = vector.extract_strided_slice %73 {offsets = [0, 0], sizes = [8, 32], strides = [1, 1]} : vector<8x96xf32> to vector<8x32xf32>
    %77 = vector.extract_strided_slice %73 {offsets = [0, 32], sizes = [8, 32], strides = [1, 1]} : vector<8x96xf32> to vector<8x32xf32>
    %78 = vector.extract_strided_slice %73 {offsets = [0, 64], sizes = [8, 32], strides = [1, 1]} : vector<8x96xf32> to vector<8x32xf32>
    %79 = arith.mulf %77, %40 : vector<8x32xf32>
    %80 = arith.mulf %76, %75 : vector<8x32xf32>
    %81 = arith.addf %79, %80 : vector<8x32xf32>
    %82 = math.tanh %81 : vector<8x32xf32>
    %83 = arith.mulf %78, %82 : vector<8x32xf32>
    %cst_38 = arith.constant dense<0.000000e+00> : vector<8x128xf32>
    %84 = tpu.matmul %83, %9, %cst_38 {dimension_numbers = #tpu.dot_dimension_numbers<[1], [0], [0], [1], [0, 0, 1, 1], [], []>} : vector<8x32xf32>, vector<32x128xf32>, vector<8x128xf32> -> vector<8x128xf32>
    %cst_39 = arith.constant dense<0.000000e+00> : vector<8x128xf32>
    %85 = tpu.matmul %62, %10, %cst_39 {dimension_numbers = #tpu.dot_dimension_numbers<[1], [0], [0], [1], [0, 0, 1, 1], [], []>} : vector<8x32xf32>, vector<32x128xf32>, vector<8x128xf32> -> vector<8x128xf32>
    %86 = arith.addf %84, %85 : vector<8x128xf32>
    %87 = arith.addf %86, %13 : vector<8x128xf32>
    %88 = vector.extract_strided_slice %87 {offsets = [0, 0], sizes = [8, 96], strides = [1, 1]} : vector<8x128xf32> to vector<8x96xf32>
    %89 = arith.negf %88 : vector<8x96xf32>
    %90 = math.exp %89 : vector<8x96xf32>
    %cst_40 = arith.constant 1.000000e+00 : f32
    %91 = vector.broadcast %cst_40 : f32 to vector<8x96xf32>
    %92 = arith.addf %91, %90 : vector<8x96xf32>
    %93 = arith.divf %91, %92 : vector<8x96xf32>
    %94 = vector.extract_strided_slice %87 {offsets = [0, 96], sizes = [8, 32], strides = [1, 1]} : vector<8x128xf32> to vector<8x32xf32>
    %95 = math.tanh %94 : vector<8x32xf32>
    %96 = vector.extract_strided_slice %93 {offsets = [0, 0], sizes = [8, 32], strides = [1, 1]} : vector<8x96xf32> to vector<8x32xf32>
    %97 = vector.extract_strided_slice %93 {offsets = [0, 32], sizes = [8, 32], strides = [1, 1]} : vector<8x96xf32> to vector<8x32xf32>
    %98 = vector.extract_strided_slice %93 {offsets = [0, 64], sizes = [8, 32], strides = [1, 1]} : vector<8x96xf32> to vector<8x32xf32>
    %99 = arith.mulf %97, %60 : vector<8x32xf32>
    %100 = arith.mulf %96, %95 : vector<8x32xf32>
    %101 = arith.addf %99, %100 : vector<8x32xf32>
    %102 = math.tanh %101 : vector<8x32xf32>
    %103 = arith.mulf %98, %102 : vector<8x32xf32>
    %c2_i32 = arith.constant 2 : i32
    %104 = arith.index_cast %c2_i32 : i32 to index
    %c0_41 = arith.constant 0 : index
    %c0_42 = arith.constant 0 : index
    %105 = vector.load %arg14[%104, %c0_41, %c0_42] : memref<8x8x128xf32, #tpu.memory_space<vmem>>, vector<1x8x128xf32>
    %106 = vector.shape_cast %105 : vector<1x8x128xf32> to vector<8x128xf32>
    %cst_43 = arith.constant dense<0.000000e+00> : vector<8x128xf32>
    %107 = tpu.matmul %83, %8, %cst_43 {dimension_numbers = #tpu.dot_dimension_numbers<[1], [0], [0], [1], [0, 0, 1, 1], [], []>} : vector<8x32xf32>, vector<32x128xf32>, vector<8x128xf32> -> vector<8x128xf32>
    %108 = arith.addf %106, %107 : vector<8x128xf32>
    %109 = vector.extract_strided_slice %108 {offsets = [0, 0], sizes = [8, 96], strides = [1, 1]} : vector<8x128xf32> to vector<8x96xf32>
    %110 = arith.negf %109 : vector<8x96xf32>
    %111 = math.exp %110 : vector<8x96xf32>
    %cst_44 = arith.constant 1.000000e+00 : f32
    %112 = vector.broadcast %cst_44 : f32 to vector<8x96xf32>
    %113 = arith.addf %112, %111 : vector<8x96xf32>
    %114 = arith.divf %112, %113 : vector<8x96xf32>
    %115 = vector.extract_strided_slice %108 {offsets = [0, 96], sizes = [8, 32], strides = [1, 1]} : vector<8x128xf32> to vector<8x32xf32>
    %116 = math.tanh %115 : vector<8x32xf32>
    %117 = vector.extract_strided_slice %114 {offsets = [0, 0], sizes = [8, 32], strides = [1, 1]} : vector<8x96xf32> to vector<8x32xf32>
    %118 = vector.extract_strided_slice %114 {offsets = [0, 32], sizes = [8, 32], strides = [1, 1]} : vector<8x96xf32> to vector<8x32xf32>
    %119 = vector.extract_strided_slice %114 {offsets = [0, 64], sizes = [8, 32], strides = [1, 1]} : vector<8x96xf32> to vector<8x32xf32>
    %120 = arith.mulf %118, %81 : vector<8x32xf32>
    %121 = arith.mulf %117, %116 : vector<8x32xf32>
    %122 = arith.addf %120, %121 : vector<8x32xf32>
    %123 = math.tanh %122 : vector<8x32xf32>
    %124 = arith.mulf %119, %123 : vector<8x32xf32>
    %cst_45 = arith.constant dense<0.000000e+00> : vector<8x128xf32>
    %125 = tpu.matmul %124, %9, %cst_45 {dimension_numbers = #tpu.dot_dimension_numbers<[1], [0], [0], [1], [0, 0, 1, 1], [], []>} : vector<8x32xf32>, vector<32x128xf32>, vector<8x128xf32> -> vector<8x128xf32>
    %cst_46 = arith.constant dense<0.000000e+00> : vector<8x128xf32>
    %126 = tpu.matmul %103, %10, %cst_46 {dimension_numbers = #tpu.dot_dimension_numbers<[1], [0], [0], [1], [0, 0, 1, 1], [], []>} : vector<8x32xf32>, vector<32x128xf32>, vector<8x128xf32> -> vector<8x128xf32>
    %127 = arith.addf %125, %126 : vector<8x128xf32>
    %128 = arith.addf %127, %13 : vector<8x128xf32>
    %129 = vector.extract_strided_slice %128 {offsets = [0, 0], sizes = [8, 96], strides = [1, 1]} : vector<8x128xf32> to vector<8x96xf32>
    %130 = arith.negf %129 : vector<8x96xf32>
    %131 = math.exp %130 : vector<8x96xf32>
    %cst_47 = arith.constant 1.000000e+00 : f32
    %132 = vector.broadcast %cst_47 : f32 to vector<8x96xf32>
    %133 = arith.addf %132, %131 : vector<8x96xf32>
    %134 = arith.divf %132, %133 : vector<8x96xf32>
    %135 = vector.extract_strided_slice %128 {offsets = [0, 96], sizes = [8, 32], strides = [1, 1]} : vector<8x128xf32> to vector<8x32xf32>
    %136 = math.tanh %135 : vector<8x32xf32>
    %137 = vector.extract_strided_slice %134 {offsets = [0, 0], sizes = [8, 32], strides = [1, 1]} : vector<8x96xf32> to vector<8x32xf32>
    %138 = vector.extract_strided_slice %134 {offsets = [0, 32], sizes = [8, 32], strides = [1, 1]} : vector<8x96xf32> to vector<8x32xf32>
    %139 = vector.extract_strided_slice %134 {offsets = [0, 64], sizes = [8, 32], strides = [1, 1]} : vector<8x96xf32> to vector<8x32xf32>
    %140 = arith.mulf %138, %101 : vector<8x32xf32>
    %141 = arith.mulf %137, %136 : vector<8x32xf32>
    %142 = arith.addf %140, %141 : vector<8x32xf32>
    %143 = math.tanh %142 : vector<8x32xf32>
    %144 = arith.mulf %139, %143 : vector<8x32xf32>
    %c3_i32 = arith.constant 3 : i32
    %145 = arith.index_cast %c3_i32 : i32 to index
    %c0_48 = arith.constant 0 : index
    %c0_49 = arith.constant 0 : index
    %146 = vector.load %arg14[%145, %c0_48, %c0_49] : memref<8x8x128xf32, #tpu.memory_space<vmem>>, vector<1x8x128xf32>
    %147 = vector.shape_cast %146 : vector<1x8x128xf32> to vector<8x128xf32>
    %cst_50 = arith.constant dense<0.000000e+00> : vector<8x128xf32>
    %148 = tpu.matmul %124, %8, %cst_50 {dimension_numbers = #tpu.dot_dimension_numbers<[1], [0], [0], [1], [0, 0, 1, 1], [], []>} : vector<8x32xf32>, vector<32x128xf32>, vector<8x128xf32> -> vector<8x128xf32>
    %149 = arith.addf %147, %148 : vector<8x128xf32>
    %150 = vector.extract_strided_slice %149 {offsets = [0, 0], sizes = [8, 96], strides = [1, 1]} : vector<8x128xf32> to vector<8x96xf32>
    %151 = arith.negf %150 : vector<8x96xf32>
    %152 = math.exp %151 : vector<8x96xf32>
    %cst_51 = arith.constant 1.000000e+00 : f32
    %153 = vector.broadcast %cst_51 : f32 to vector<8x96xf32>
    %154 = arith.addf %153, %152 : vector<8x96xf32>
    %155 = arith.divf %153, %154 : vector<8x96xf32>
    %156 = vector.extract_strided_slice %149 {offsets = [0, 96], sizes = [8, 32], strides = [1, 1]} : vector<8x128xf32> to vector<8x32xf32>
    %157 = math.tanh %156 : vector<8x32xf32>
    %158 = vector.extract_strided_slice %155 {offsets = [0, 0], sizes = [8, 32], strides = [1, 1]} : vector<8x96xf32> to vector<8x32xf32>
    %159 = vector.extract_strided_slice %155 {offsets = [0, 32], sizes = [8, 32], strides = [1, 1]} : vector<8x96xf32> to vector<8x32xf32>
    %160 = vector.extract_strided_slice %155 {offsets = [0, 64], sizes = [8, 32], strides = [1, 1]} : vector<8x96xf32> to vector<8x32xf32>
    %161 = arith.mulf %159, %122 : vector<8x32xf32>
    %162 = arith.mulf %158, %157 : vector<8x32xf32>
    %163 = arith.addf %161, %162 : vector<8x32xf32>
    %164 = math.tanh %163 : vector<8x32xf32>
    %165 = arith.mulf %160, %164 : vector<8x32xf32>
    %cst_52 = arith.constant dense<0.000000e+00> : vector<8x128xf32>
    %166 = tpu.matmul %165, %9, %cst_52 {dimension_numbers = #tpu.dot_dimension_numbers<[1], [0], [0], [1], [0, 0, 1, 1], [], []>} : vector<8x32xf32>, vector<32x128xf32>, vector<8x128xf32> -> vector<8x128xf32>
    %cst_53 = arith.constant dense<0.000000e+00> : vector<8x128xf32>
    %167 = tpu.matmul %144, %10, %cst_53 {dimension_numbers = #tpu.dot_dimension_numbers<[1], [0], [0], [1], [0, 0, 1, 1], [], []>} : vector<8x32xf32>, vector<32x128xf32>, vector<8x128xf32> -> vector<8x128xf32>
    %168 = arith.addf %166, %167 : vector<8x128xf32>
    %169 = arith.addf %168, %13 : vector<8x128xf32>
    %170 = vector.extract_strided_slice %169 {offsets = [0, 0], sizes = [8, 96], strides = [1, 1]} : vector<8x128xf32> to vector<8x96xf32>
    %171 = arith.negf %170 : vector<8x96xf32>
    %172 = math.exp %171 : vector<8x96xf32>
    %cst_54 = arith.constant 1.000000e+00 : f32
    %173 = vector.broadcast %cst_54 : f32 to vector<8x96xf32>
    %174 = arith.addf %173, %172 : vector<8x96xf32>
    %175 = arith.divf %173, %174 : vector<8x96xf32>
    %176 = vector.extract_strided_slice %169 {offsets = [0, 96], sizes = [8, 32], strides = [1, 1]} : vector<8x128xf32> to vector<8x32xf32>
    %177 = math.tanh %176 : vector<8x32xf32>
    %178 = vector.extract_strided_slice %175 {offsets = [0, 0], sizes = [8, 32], strides = [1, 1]} : vector<8x96xf32> to vector<8x32xf32>
    %179 = vector.extract_strided_slice %175 {offsets = [0, 32], sizes = [8, 32], strides = [1, 1]} : vector<8x96xf32> to vector<8x32xf32>
    %180 = vector.extract_strided_slice %175 {offsets = [0, 64], sizes = [8, 32], strides = [1, 1]} : vector<8x96xf32> to vector<8x32xf32>
    %181 = arith.mulf %179, %142 : vector<8x32xf32>
    %182 = arith.mulf %178, %177 : vector<8x32xf32>
    %183 = arith.addf %181, %182 : vector<8x32xf32>
    %184 = math.tanh %183 : vector<8x32xf32>
    %185 = arith.mulf %180, %184 : vector<8x32xf32>
    %c4_i32 = arith.constant 4 : i32
    %186 = arith.index_cast %c4_i32 : i32 to index
    %c0_55 = arith.constant 0 : index
    %c0_56 = arith.constant 0 : index
    %187 = vector.load %arg14[%186, %c0_55, %c0_56] : memref<8x8x128xf32, #tpu.memory_space<vmem>>, vector<1x8x128xf32>
    %188 = vector.shape_cast %187 : vector<1x8x128xf32> to vector<8x128xf32>
    %cst_57 = arith.constant dense<0.000000e+00> : vector<8x128xf32>
    %189 = tpu.matmul %165, %8, %cst_57 {dimension_numbers = #tpu.dot_dimension_numbers<[1], [0], [0], [1], [0, 0, 1, 1], [], []>} : vector<8x32xf32>, vector<32x128xf32>, vector<8x128xf32> -> vector<8x128xf32>
    %190 = arith.addf %188, %189 : vector<8x128xf32>
    %191 = vector.extract_strided_slice %190 {offsets = [0, 0], sizes = [8, 96], strides = [1, 1]} : vector<8x128xf32> to vector<8x96xf32>
    %192 = arith.negf %191 : vector<8x96xf32>
    %193 = math.exp %192 : vector<8x96xf32>
    %cst_58 = arith.constant 1.000000e+00 : f32
    %194 = vector.broadcast %cst_58 : f32 to vector<8x96xf32>
    %195 = arith.addf %194, %193 : vector<8x96xf32>
    %196 = arith.divf %194, %195 : vector<8x96xf32>
    %197 = vector.extract_strided_slice %190 {offsets = [0, 96], sizes = [8, 32], strides = [1, 1]} : vector<8x128xf32> to vector<8x32xf32>
    %198 = math.tanh %197 : vector<8x32xf32>
    %199 = vector.extract_strided_slice %196 {offsets = [0, 0], sizes = [8, 32], strides = [1, 1]} : vector<8x96xf32> to vector<8x32xf32>
    %200 = vector.extract_strided_slice %196 {offsets = [0, 32], sizes = [8, 32], strides = [1, 1]} : vector<8x96xf32> to vector<8x32xf32>
    %201 = vector.extract_strided_slice %196 {offsets = [0, 64], sizes = [8, 32], strides = [1, 1]} : vector<8x96xf32> to vector<8x32xf32>
    %202 = arith.mulf %200, %163 : vector<8x32xf32>
    %203 = arith.mulf %199, %198 : vector<8x32xf32>
    %204 = arith.addf %202, %203 : vector<8x32xf32>
    %205 = math.tanh %204 : vector<8x32xf32>
    %206 = arith.mulf %201, %205 : vector<8x32xf32>
    %cst_59 = arith.constant dense<0.000000e+00> : vector<8x128xf32>
    %207 = tpu.matmul %206, %9, %cst_59 {dimension_numbers = #tpu.dot_dimension_numbers<[1], [0], [0], [1], [0, 0, 1, 1], [], []>} : vector<8x32xf32>, vector<32x128xf32>, vector<8x128xf32> -> vector<8x128xf32>
    %cst_60 = arith.constant dense<0.000000e+00> : vector<8x128xf32>
    %208 = tpu.matmul %185, %10, %cst_60 {dimension_numbers = #tpu.dot_dimension_numbers<[1], [0], [0], [1], [0, 0, 1, 1], [], []>} : vector<8x32xf32>, vector<32x128xf32>, vector<8x128xf32> -> vector<8x128xf32>
    %209 = arith.addf %207, %208 : vector<8x128xf32>
    %210 = arith.addf %209, %13 : vector<8x128xf32>
    %211 = vector.extract_strided_slice %210 {offsets = [0, 0], sizes = [8, 96], strides = [1, 1]} : vector<8x128xf32> to vector<8x96xf32>
    %212 = arith.negf %211 : vector<8x96xf32>
    %213 = math.exp %212 : vector<8x96xf32>
    %cst_61 = arith.constant 1.000000e+00 : f32
    %214 = vector.broadcast %cst_61 : f32 to vector<8x96xf32>
    %215 = arith.addf %214, %213 : vector<8x96xf32>
    %216 = arith.divf %214, %215 : vector<8x96xf32>
    %217 = vector.extract_strided_slice %210 {offsets = [0, 96], sizes = [8, 32], strides = [1, 1]} : vector<8x128xf32> to vector<8x32xf32>
    %218 = math.tanh %217 : vector<8x32xf32>
    %219 = vector.extract_strided_slice %216 {offsets = [0, 0], sizes = [8, 32], strides = [1, 1]} : vector<8x96xf32> to vector<8x32xf32>
    %220 = vector.extract_strided_slice %216 {offsets = [0, 32], sizes = [8, 32], strides = [1, 1]} : vector<8x96xf32> to vector<8x32xf32>
    %221 = vector.extract_strided_slice %216 {offsets = [0, 64], sizes = [8, 32], strides = [1, 1]} : vector<8x96xf32> to vector<8x32xf32>
    %222 = arith.mulf %220, %183 : vector<8x32xf32>
    %223 = arith.mulf %219, %218 : vector<8x32xf32>
    %224 = arith.addf %222, %223 : vector<8x32xf32>
    %225 = math.tanh %224 : vector<8x32xf32>
    %226 = arith.mulf %221, %225 : vector<8x32xf32>
    %c5_i32 = arith.constant 5 : i32
    %227 = arith.index_cast %c5_i32 : i32 to index
    %c0_62 = arith.constant 0 : index
    %c0_63 = arith.constant 0 : index
    %228 = vector.load %arg14[%227, %c0_62, %c0_63] : memref<8x8x128xf32, #tpu.memory_space<vmem>>, vector<1x8x128xf32>
    %229 = vector.shape_cast %228 : vector<1x8x128xf32> to vector<8x128xf32>
    %cst_64 = arith.constant dense<0.000000e+00> : vector<8x128xf32>
    %230 = tpu.matmul %206, %8, %cst_64 {dimension_numbers = #tpu.dot_dimension_numbers<[1], [0], [0], [1], [0, 0, 1, 1], [], []>} : vector<8x32xf32>, vector<32x128xf32>, vector<8x128xf32> -> vector<8x128xf32>
    %231 = arith.addf %229, %230 : vector<8x128xf32>
    %232 = vector.extract_strided_slice %231 {offsets = [0, 0], sizes = [8, 96], strides = [1, 1]} : vector<8x128xf32> to vector<8x96xf32>
    %233 = arith.negf %232 : vector<8x96xf32>
    %234 = math.exp %233 : vector<8x96xf32>
    %cst_65 = arith.constant 1.000000e+00 : f32
    %235 = vector.broadcast %cst_65 : f32 to vector<8x96xf32>
    %236 = arith.addf %235, %234 : vector<8x96xf32>
    %237 = arith.divf %235, %236 : vector<8x96xf32>
    %238 = vector.extract_strided_slice %231 {offsets = [0, 96], sizes = [8, 32], strides = [1, 1]} : vector<8x128xf32> to vector<8x32xf32>
    %239 = math.tanh %238 : vector<8x32xf32>
    %240 = vector.extract_strided_slice %237 {offsets = [0, 0], sizes = [8, 32], strides = [1, 1]} : vector<8x96xf32> to vector<8x32xf32>
    %241 = vector.extract_strided_slice %237 {offsets = [0, 32], sizes = [8, 32], strides = [1, 1]} : vector<8x96xf32> to vector<8x32xf32>
    %242 = vector.extract_strided_slice %237 {offsets = [0, 64], sizes = [8, 32], strides = [1, 1]} : vector<8x96xf32> to vector<8x32xf32>
    %243 = arith.mulf %241, %204 : vector<8x32xf32>
    %244 = arith.mulf %240, %239 : vector<8x32xf32>
    %245 = arith.addf %243, %244 : vector<8x32xf32>
    %246 = math.tanh %245 : vector<8x32xf32>
    %247 = arith.mulf %242, %246 : vector<8x32xf32>
    %cst_66 = arith.constant dense<0.000000e+00> : vector<8x128xf32>
    %248 = tpu.matmul %247, %9, %cst_66 {dimension_numbers = #tpu.dot_dimension_numbers<[1], [0], [0], [1], [0, 0, 1, 1], [], []>} : vector<8x32xf32>, vector<32x128xf32>, vector<8x128xf32> -> vector<8x128xf32>
    %cst_67 = arith.constant dense<0.000000e+00> : vector<8x128xf32>
    %249 = tpu.matmul %226, %10, %cst_67 {dimension_numbers = #tpu.dot_dimension_numbers<[1], [0], [0], [1], [0, 0, 1, 1], [], []>} : vector<8x32xf32>, vector<32x128xf32>, vector<8x128xf32> -> vector<8x128xf32>
    %250 = arith.addf %248, %249 : vector<8x128xf32>
    %251 = arith.addf %250, %13 : vector<8x128xf32>
    %252 = vector.extract_strided_slice %251 {offsets = [0, 0], sizes = [8, 96], strides = [1, 1]} : vector<8x128xf32> to vector<8x96xf32>
    %253 = arith.negf %252 : vector<8x96xf32>
    %254 = math.exp %253 : vector<8x96xf32>
    %cst_68 = arith.constant 1.000000e+00 : f32
    %255 = vector.broadcast %cst_68 : f32 to vector<8x96xf32>
    %256 = arith.addf %255, %254 : vector<8x96xf32>
    %257 = arith.divf %255, %256 : vector<8x96xf32>
    %258 = vector.extract_strided_slice %251 {offsets = [0, 96], sizes = [8, 32], strides = [1, 1]} : vector<8x128xf32> to vector<8x32xf32>
    %259 = math.tanh %258 : vector<8x32xf32>
    %260 = vector.extract_strided_slice %257 {offsets = [0, 0], sizes = [8, 32], strides = [1, 1]} : vector<8x96xf32> to vector<8x32xf32>
    %261 = vector.extract_strided_slice %257 {offsets = [0, 32], sizes = [8, 32], strides = [1, 1]} : vector<8x96xf32> to vector<8x32xf32>
    %262 = vector.extract_strided_slice %257 {offsets = [0, 64], sizes = [8, 32], strides = [1, 1]} : vector<8x96xf32> to vector<8x32xf32>
    %263 = arith.mulf %261, %224 : vector<8x32xf32>
    %264 = arith.mulf %260, %259 : vector<8x32xf32>
    %265 = arith.addf %263, %264 : vector<8x32xf32>
    %266 = math.tanh %265 : vector<8x32xf32>
    %267 = arith.mulf %262, %266 : vector<8x32xf32>
    %c6_i32 = arith.constant 6 : i32
    %268 = arith.index_cast %c6_i32 : i32 to index
    %c0_69 = arith.constant 0 : index
    %c0_70 = arith.constant 0 : index
    %269 = vector.load %arg14[%268, %c0_69, %c0_70] : memref<8x8x128xf32, #tpu.memory_space<vmem>>, vector<1x8x128xf32>
    %270 = vector.shape_cast %269 : vector<1x8x128xf32> to vector<8x128xf32>
    %cst_71 = arith.constant dense<0.000000e+00> : vector<8x128xf32>
    %271 = tpu.matmul %247, %8, %cst_71 {dimension_numbers = #tpu.dot_dimension_numbers<[1], [0], [0], [1], [0, 0, 1, 1], [], []>} : vector<8x32xf32>, vector<32x128xf32>, vector<8x128xf32> -> vector<8x128xf32>
    %272 = arith.addf %270, %271 : vector<8x128xf32>
    %273 = vector.extract_strided_slice %272 {offsets = [0, 0], sizes = [8, 96], strides = [1, 1]} : vector<8x128xf32> to vector<8x96xf32>
    %274 = arith.negf %273 : vector<8x96xf32>
    %275 = math.exp %274 : vector<8x96xf32>
    %cst_72 = arith.constant 1.000000e+00 : f32
    %276 = vector.broadcast %cst_72 : f32 to vector<8x96xf32>
    %277 = arith.addf %276, %275 : vector<8x96xf32>
    %278 = arith.divf %276, %277 : vector<8x96xf32>
    %279 = vector.extract_strided_slice %272 {offsets = [0, 96], sizes = [8, 32], strides = [1, 1]} : vector<8x128xf32> to vector<8x32xf32>
    %280 = math.tanh %279 : vector<8x32xf32>
    %281 = vector.extract_strided_slice %278 {offsets = [0, 0], sizes = [8, 32], strides = [1, 1]} : vector<8x96xf32> to vector<8x32xf32>
    %282 = vector.extract_strided_slice %278 {offsets = [0, 32], sizes = [8, 32], strides = [1, 1]} : vector<8x96xf32> to vector<8x32xf32>
    %283 = vector.extract_strided_slice %278 {offsets = [0, 64], sizes = [8, 32], strides = [1, 1]} : vector<8x96xf32> to vector<8x32xf32>
    %284 = arith.mulf %282, %245 : vector<8x32xf32>
    %285 = arith.mulf %281, %280 : vector<8x32xf32>
    %286 = arith.addf %284, %285 : vector<8x32xf32>
    %287 = math.tanh %286 : vector<8x32xf32>
    %288 = arith.mulf %283, %287 : vector<8x32xf32>
    %cst_73 = arith.constant dense<0.000000e+00> : vector<8x128xf32>
    %289 = tpu.matmul %288, %9, %cst_73 {dimension_numbers = #tpu.dot_dimension_numbers<[1], [0], [0], [1], [0, 0, 1, 1], [], []>} : vector<8x32xf32>, vector<32x128xf32>, vector<8x128xf32> -> vector<8x128xf32>
    %cst_74 = arith.constant dense<0.000000e+00> : vector<8x128xf32>
    %290 = tpu.matmul %267, %10, %cst_74 {dimension_numbers = #tpu.dot_dimension_numbers<[1], [0], [0], [1], [0, 0, 1, 1], [], []>} : vector<8x32xf32>, vector<32x128xf32>, vector<8x128xf32> -> vector<8x128xf32>
    %291 = arith.addf %289, %290 : vector<8x128xf32>
    %292 = arith.addf %291, %13 : vector<8x128xf32>
    %293 = vector.extract_strided_slice %292 {offsets = [0, 0], sizes = [8, 96], strides = [1, 1]} : vector<8x128xf32> to vector<8x96xf32>
    %294 = arith.negf %293 : vector<8x96xf32>
    %295 = math.exp %294 : vector<8x96xf32>
    %cst_75 = arith.constant 1.000000e+00 : f32
    %296 = vector.broadcast %cst_75 : f32 to vector<8x96xf32>
    %297 = arith.addf %296, %295 : vector<8x96xf32>
    %298 = arith.divf %296, %297 : vector<8x96xf32>
    %299 = vector.extract_strided_slice %292 {offsets = [0, 96], sizes = [8, 32], strides = [1, 1]} : vector<8x128xf32> to vector<8x32xf32>
    %300 = math.tanh %299 : vector<8x32xf32>
    %301 = vector.extract_strided_slice %298 {offsets = [0, 0], sizes = [8, 32], strides = [1, 1]} : vector<8x96xf32> to vector<8x32xf32>
    %302 = vector.extract_strided_slice %298 {offsets = [0, 32], sizes = [8, 32], strides = [1, 1]} : vector<8x96xf32> to vector<8x32xf32>
    %303 = vector.extract_strided_slice %298 {offsets = [0, 64], sizes = [8, 32], strides = [1, 1]} : vector<8x96xf32> to vector<8x32xf32>
    %304 = arith.mulf %302, %265 : vector<8x32xf32>
    %305 = arith.mulf %301, %300 : vector<8x32xf32>
    %306 = arith.addf %304, %305 : vector<8x32xf32>
    %307 = math.tanh %306 : vector<8x32xf32>
    %308 = arith.mulf %303, %307 : vector<8x32xf32>
    %c7_i32 = arith.constant 7 : i32
    %309 = arith.index_cast %c7_i32 : i32 to index
    %c0_76 = arith.constant 0 : index
    %c0_77 = arith.constant 0 : index
    %310 = vector.load %arg14[%309, %c0_76, %c0_77] : memref<8x8x128xf32, #tpu.memory_space<vmem>>, vector<1x8x128xf32>
    %311 = vector.shape_cast %310 : vector<1x8x128xf32> to vector<8x128xf32>
    %cst_78 = arith.constant dense<0.000000e+00> : vector<8x128xf32>
    %312 = tpu.matmul %288, %8, %cst_78 {dimension_numbers = #tpu.dot_dimension_numbers<[1], [0], [0], [1], [0, 0, 1, 1], [], []>} : vector<8x32xf32>, vector<32x128xf32>, vector<8x128xf32> -> vector<8x128xf32>
    %313 = arith.addf %311, %312 : vector<8x128xf32>
    %314 = vector.extract_strided_slice %313 {offsets = [0, 0], sizes = [8, 96], strides = [1, 1]} : vector<8x128xf32> to vector<8x96xf32>
    %315 = arith.negf %314 : vector<8x96xf32>
    %316 = math.exp %315 : vector<8x96xf32>
    %cst_79 = arith.constant 1.000000e+00 : f32
    %317 = vector.broadcast %cst_79 : f32 to vector<8x96xf32>
    %318 = arith.addf %317, %316 : vector<8x96xf32>
    %319 = arith.divf %317, %318 : vector<8x96xf32>
    %320 = vector.extract_strided_slice %313 {offsets = [0, 96], sizes = [8, 32], strides = [1, 1]} : vector<8x128xf32> to vector<8x32xf32>
    %321 = math.tanh %320 : vector<8x32xf32>
    %322 = vector.extract_strided_slice %319 {offsets = [0, 0], sizes = [8, 32], strides = [1, 1]} : vector<8x96xf32> to vector<8x32xf32>
    %323 = vector.extract_strided_slice %319 {offsets = [0, 32], sizes = [8, 32], strides = [1, 1]} : vector<8x96xf32> to vector<8x32xf32>
    %324 = vector.extract_strided_slice %319 {offsets = [0, 64], sizes = [8, 32], strides = [1, 1]} : vector<8x96xf32> to vector<8x32xf32>
    %325 = arith.mulf %323, %286 : vector<8x32xf32>
    %326 = arith.mulf %322, %321 : vector<8x32xf32>
    %327 = arith.addf %325, %326 : vector<8x32xf32>
    %328 = math.tanh %327 : vector<8x32xf32>
    %329 = arith.mulf %324, %328 : vector<8x32xf32>
    %cst_80 = arith.constant dense<0.000000e+00> : vector<8x128xf32>
    %330 = tpu.matmul %329, %9, %cst_80 {dimension_numbers = #tpu.dot_dimension_numbers<[1], [0], [0], [1], [0, 0, 1, 1], [], []>} : vector<8x32xf32>, vector<32x128xf32>, vector<8x128xf32> -> vector<8x128xf32>
    %cst_81 = arith.constant dense<0.000000e+00> : vector<8x128xf32>
    %331 = tpu.matmul %308, %10, %cst_81 {dimension_numbers = #tpu.dot_dimension_numbers<[1], [0], [0], [1], [0, 0, 1, 1], [], []>} : vector<8x32xf32>, vector<32x128xf32>, vector<8x128xf32> -> vector<8x128xf32>
    %332 = arith.addf %330, %331 : vector<8x128xf32>
    %333 = arith.addf %332, %13 : vector<8x128xf32>
    %334 = vector.extract_strided_slice %333 {offsets = [0, 0], sizes = [8, 96], strides = [1, 1]} : vector<8x128xf32> to vector<8x96xf32>
    %335 = arith.negf %334 : vector<8x96xf32>
    %336 = math.exp %335 : vector<8x96xf32>
    %cst_82 = arith.constant 1.000000e+00 : f32
    %337 = vector.broadcast %cst_82 : f32 to vector<8x96xf32>
    %338 = arith.addf %337, %336 : vector<8x96xf32>
    %339 = arith.divf %337, %338 : vector<8x96xf32>
    %340 = vector.extract_strided_slice %333 {offsets = [0, 96], sizes = [8, 32], strides = [1, 1]} : vector<8x128xf32> to vector<8x32xf32>
    %341 = math.tanh %340 : vector<8x32xf32>
    %342 = vector.extract_strided_slice %339 {offsets = [0, 0], sizes = [8, 32], strides = [1, 1]} : vector<8x96xf32> to vector<8x32xf32>
    %343 = vector.extract_strided_slice %339 {offsets = [0, 32], sizes = [8, 32], strides = [1, 1]} : vector<8x96xf32> to vector<8x32xf32>
    %344 = vector.extract_strided_slice %339 {offsets = [0, 64], sizes = [8, 32], strides = [1, 1]} : vector<8x96xf32> to vector<8x32xf32>
    %345 = arith.mulf %343, %306 : vector<8x32xf32>
    %346 = arith.mulf %342, %341 : vector<8x32xf32>
    %347 = arith.addf %345, %346 : vector<8x32xf32>
    %348 = math.tanh %347 : vector<8x32xf32>
    %349 = arith.mulf %344, %348 : vector<8x32xf32>
    %c8_i32 = arith.constant 8 : i32
    %c0_83 = arith.constant 0 : index
    %c0_84 = arith.constant 0 : index
    %350 = vector.load %arg9[%c0_83, %c0_84] : memref<1x32xf32, #tpu.memory_space<vmem>>, vector<1x32xf32>
    %351 = vector.broadcast %350 : vector<1x32xf32> to vector<8x32xf32>
    %352 = arith.mulf %349, %351 : vector<8x32xf32>
    %cst_85 = arith.constant dense<0.000000e+00> : vector<8xf32>
    %353 = vector.multi_reduction <add>, %352, %cst_85 [1] : vector<8x32xf32> to vector<8xf32>
    %354 = vector.shape_cast %353 : vector<8xf32> to vector<8x1xf32>
    %c0_86 = arith.constant 0 : index
    %c0_87 = arith.constant 0 : index
    %355 = vector.load %arg10[%c0_86, %c0_87] : memref<1x1xf32, #tpu.memory_space<vmem>>, vector<1x1xf32>
    %356 = vector.broadcast %355 : vector<1x1xf32> to vector<8x1xf32>
    %357 = arith.addf %354, %356 : vector<8x1xf32>
    %358 = arith.negf %357 : vector<8x1xf32>
    %359 = math.exp %358 : vector<8x1xf32>
    %cst_88 = arith.constant 1.000000e+00 : f32
    %360 = vector.broadcast %cst_88 : f32 to vector<8x1xf32>
    %361 = arith.addf %360, %359 : vector<8x1xf32>
    %362 = arith.divf %360, %361 : vector<8x1xf32>
    %c0_89 = arith.constant 0 : index
    %c0_90 = arith.constant 0 : index
    %363 = vector.load %arg11[%c0_89, %c0_90] : memref<8x1xf32, #tpu.memory_space<vmem>>, vector<8x1xf32>
    tpu.vector_store %arg11[%c0_89, %c0_90], %362 {strides = array<i32>} : memref<8x1xf32, #tpu.memory_space<vmem>>, vector<8x1xf32>,
    %c0_91 = arith.constant 0 : index
    %c0_92 = arith.constant 0 : index
    %c0_93 = arith.constant 0 : index
    %364 = vector.load %arg12[%c0_91, %c0_92, %c0_93] : memref<2x8x32xf32, #tpu.memory_space<vmem>>, vector<1x8x32xf32>
    %365 = vector.shape_cast %364 : vector<1x8x32xf32> to vector<8x32xf32>
    %366 = vector.shape_cast %329 : vector<8x32xf32> to vector<1x8x32xf32>
    tpu.vector_store %arg12[%c0_91, %c0_92, %c0_93], %366 {strides = array<i32>} : memref<2x8x32xf32, #tpu.memory_space<vmem>>, vector<1x8x32xf32>,
    %c1_94 = arith.constant 1 : index
    %c0_95 = arith.constant 0 : index
    %c0_96 = arith.constant 0 : index
    %367 = vector.load %arg12[%c1_94, %c0_95, %c0_96] : memref<2x8x32xf32, #tpu.memory_space<vmem>>, vector<1x8x32xf32>
    %368 = vector.shape_cast %367 : vector<1x8x32xf32> to vector<8x32xf32>
    %369 = vector.shape_cast %349 : vector<8x32xf32> to vector<1x8x32xf32>
    tpu.vector_store %arg12[%c1_94, %c0_95, %c0_96], %369 {strides = array<i32>} : memref<2x8x32xf32, #tpu.memory_space<vmem>>, vector<1x8x32xf32>,
    %c0_97 = arith.constant 0 : index
    %c0_98 = arith.constant 0 : index
    %c0_99 = arith.constant 0 : index
    %370 = vector.load %arg13[%c0_97, %c0_98, %c0_99] : memref<2x8x32xf32, #tpu.memory_space<vmem>>, vector<1x8x32xf32>
    %371 = vector.shape_cast %370 : vector<1x8x32xf32> to vector<8x32xf32>
    %372 = vector.shape_cast %327 : vector<8x32xf32> to vector<1x8x32xf32>
    tpu.vector_store %arg13[%c0_97, %c0_98, %c0_99], %372 {strides = array<i32>} : memref<2x8x32xf32, #tpu.memory_space<vmem>>, vector<1x8x32xf32>,
    %c1_100 = arith.constant 1 : index
    %c0_101 = arith.constant 0 : index
    %c0_102 = arith.constant 0 : index
    %373 = vector.load %arg13[%c1_100, %c0_101, %c0_102] : memref<2x8x32xf32, #tpu.memory_space<vmem>>, vector<1x8x32xf32>
    %374 = vector.shape_cast %373 : vector<1x8x32xf32> to vector<8x32xf32>
    %375 = vector.shape_cast %347 : vector<8x32xf32> to vector<1x8x32xf32>
    tpu.vector_store %arg13[%c1_100, %c0_101, %c0_102], %375 {strides = array<i32>} : memref<2x8x32xf32, #tpu.memory_space<vmem>>, vector<1x8x32xf32>,
    return
  }
}

</mosaic_0001>

<bundles_post_ra>
// kernel: tpu_custom_call.1
= control target key start
LH: loop header
LB: loop body
LE: loop exit
PB: predicated region body
PF: predicated region fallthrough
CT: control target
= control target key end

     0   :  { %s2318_s0 = inlined_call_operand.vmem [shape: f32[64,32], index: 0, kind: input, shape index: {}]   ;;  %s2319_s1 = inlined_call_operand.hbm [shape: f32[2,8,32], index: 1, kind: input, shape index: {}]   ;;  %s2320_s2 = inlined_call_operand.hbm [shape: f32[2,8,32], index: 2, kind: input, shape index: {}]   ;;  %s2321_s3 = inlined_call_operand.vmem [shape: f32[32,128], index: 3, kind: input, shape index: {}]   ;;  %s2322_s4 = inlined_call_operand.vmem [shape: f32[32,128], index: 4, kind: input, shape index: {}]   ;;  %s2323_s5 = inlined_call_operand.vmem [shape: f32[1,128], index: 5, kind: input, shape index: {}]   ;;  %s2324_s6 = inlined_call_operand.vmem [shape: f32[32,128], index: 6, kind: input, shape index: {}]   ;;  %s2325_s7 = inlined_call_operand.hbm [shape: f32[32,128], index: 7, kind: input, shape index: {}]   ;;  %s2326_s8 = inlined_call_operand.vmem [shape: f32[1,128], index: 8, kind: input, shape index: {}]   ;;  %s2327_s9 = inlined_call_operand.vmem [shape: f32[1,32], index: 9, kind: input, shape index: {}]   ;;  %s2328_s10 = inlined_call_operand.<no memory space> [shape: f32[1,1], index: 10, kind: input, shape index: {}]   ;;  %s2329_s11 = inlined_call_operand.vmem [shape: f32[8,1], index: 11, kind: output, shape index: {0}]   ;;  %s2330_s12 = inlined_call_operand.hbm [shape: f32[2,8,32], index: 12, kind: output, shape index: {1}]   ;;  %s2331_s13 = inlined_call_operand.hbm [shape: f32[2,8,32], index: 13, kind: output, shape index: {2}]  }
   0x1   :  { %v19_v0 = vstv %s2328_s10 }
   0x2   :  { %20 = vst [vmem:[#allocation3] sm:$0x1] %v19_v0 }
   0x3   :  { %21 = vsyncpa [#allocation5], 0 }
   0x4   :  { %22 = vsyncpa [#allocation8], 0 }
   0x5   :  { %23 = vsyncpa [#allocation6], 0 }
   0x6   :  { %24 = vsyncpa [#allocation12], 0  ;;  %s44_s29 = sshll.u32 %s2320_s2, 4  ;;  %s1825_s30 = smov [#allocation7]   ;;  %s45_s29 = int_to_ptr.hbm [resolvable:$true] %s44_s29 }
   0x7   :  { %s46_s14 = sshll.u32 %s1825_s30, 4  ;;  %s31_s17 = sshll.u32 %s2319_s1, 4  ;;  %s47_s14 = int_to_ptr.vmem [resolvable:$true] %s46_s14  ;;  %s32_s17 = int_to_ptr.hbm [resolvable:$true] %s31_s17 }
   0x8   :  { %s1826_s18 = smov 128   ;;  %s1827_s19 = smov 8  }
   0x9   :  { %52 = dma.hbm_to_vmem [thread:$0]  %s45_s29, 256, %s47_s14, [#allocation8], %s1826_s18, %s1826_s18, %s1827_s19  }
   0xa   :  { %s1828_s10 = smov [#allocation4]   ;;  %s65_s2 = sshll.u32 %s2325_s7, 4  ;;  %s66_s2 = int_to_ptr.hbm [resolvable:$true] %s65_s2 }
   0xb   :  { %s33_s20 = sshll.u32 %s1828_s10, 4  ;;  %s1829_s1 = smov [#allocation9]   ;;  %s34_s20 = int_to_ptr.vmem [resolvable:$true] %s33_s20 }
   0xc   :  { %39 = dma.hbm_to_vmem [thread:$0]  %s32_s17, 256, %s34_s20, [#allocation5], %s1826_s18, %s1826_s18, %s1827_s19  }
   0xd   :  { %s67_s23 = sshll.u32 %s1829_s1, 4  ;;  %s68_s23 = int_to_ptr.vmem [resolvable:$true] %s67_s23 }
   0xe   :  { %73 = dma.hbm_to_vmem [thread:$0]  %s66_s2, 512, %s68_s23, [#allocation8], %s1826_s18, %s1826_s18, %s1827_s19  }
   0xf   :  { %1817 = dma.done.wait [#allocation5], 256  }
  0x10   :  { %1818 = vsyncadd [#allocation5], 4294967040 }
  0x11   :  { %1819 = dma.done.wait [#allocation8], 768  }
  0x12   :  { %1820 = vsyncadd [#allocation8], 4294966528  ;;  %v103_v1 = vld [vmem:[%s2321_s3 + $0x18] sm:$0xff]  ;;  %v102_v2 = vld [vmem:[%s2321_s3 + $0x10] sm:$0xff]  ;;  %vm108_vm0 = vcmask 261120   ;;  %s1830_s23 = smov 32  }
  0x13   :  { %v1935_v3 = vld [vmem:[%s2322_s4 + $0x18] sm:$0xff]  ;;  %145 = vmatpush.msra.mxu0 %v103_v1  ;;  %v1941_v4 = vld [vmem:[%s2322_s4 + $0x10] sm:$0xff]  ;;  %v101_v5 = vld [vmem:[%s2321_s3 + $0x8] sm:$0xff]  ;;  %s1832_s30 = smov 96   ;;  %s1834_s16 = smov [#allocation11]  }
  0x14   :  { %220 = vmatpush.msra.mxu1 %v1935_v3  ;;  %v1949_v6 = vld [vmem:[%s2322_s4 + $0x8] sm:$0xff]  ;;  %v100_v7 = vld [vmem:[%s2321_s3] sm:$0xff]  ;;  %v199_v17 = vld [vmem:[#allocation7] sm:$0xff]  ;;  %s1474_s17 = sshll.u32 %s1834_s16, 4  ;;  %s1476_s21 = sshll.u32 %s2331_s13, 4  ;;  %s1475_s17 = int_to_ptr.vmem [resolvable:$true] %s1474_s17  ;;  %s1477_s21 = int_to_ptr.hbm [resolvable:$true] %s1476_s21 }
  0x15   :  { %146 = vmatpush.msra.mxu0 %v102_v2  ;;  %v1958_v8 = vld [vmem:[%s2322_s4] sm:$0xff]  ;;  %v1993_v39 = vld [vmem:[%s2324_s6 + $0x18] sm:$0xff]  ;;  %v2002_v41 = vld [vmem:[%s2324_s6 + $0x10] sm:$0xff] }
  0x16   :  { %221 = vmatpush.msra.mxu1 %v1941_v4  ;;  %v92_v9 = vld [vmem:[%s2318_s0] sm:$0xff]  ;;  %v1995_v40 = vld [vmem:[#allocation9 + $0x10] sm:$0xff]  ;;  %310 = vmatpush.msra.mxu3 %v1993_v39  ;;  %v2004_v42 = vld [vmem:[#allocation9 + $0x8] sm:$0xff] }
  0x17   :  { %147 = vmatpush.msra.mxu0 %v101_v5  ;;  %v198_v10 = vld [vmem:[#allocation4] sm:$0xff]  ;;  %v1978_v11 = vld [vmem:[%s2323_s5] ss:$0 sm:$0xff]  ;;  %v201_v49 = vld [vmem:[#allocation4 + $0x8] sm:$0xff] }
  0x18   :  { %222 = vmatpush.msra.mxu1 %v1949_v6  ;;  %v1988_v38 = vld [vmem:[#allocation9 + $0x18] sm:$0xff]  ;;  %v2009_v43 = vld [vmem:[%s2324_s6 + $0x8] sm:$0xff]  ;;  %311 = vmatpush.msra.mxu3 %v2002_v41 }
  0x19   :  { %148 = vmatpush.msra.mxu0 %v100_v7  ;;  %285 = vmatpush.msra.mxu2 %v1988_v38  ;;  %v93_v44 = vld [vmem:[%s2318_s0 + $0x8] sm:$0xff]  ;;  %v2022_v46 = vld [vmem:[%s2324_s6] sm:$0xff]  ;;  %s1831_s6 = smov 64  }
  0x1a   :  { %223 = vmatpush.msra.mxu1 %v1958_v8  ;;  %1497 = vmatmul.msk.f32.vlgmr.msra.gmra.mxu0 %vm108_vm0, %v92_v9  ;;  %v2017_v45 = vld [vmem:[#allocation9] sm:$0xff]  ;;  %v203_v50 = vld [vmem:[#allocation7 + $0x8] sm:$0xff] }
  0x1b   :  { %1505 = vmatmul.msk.f32.vlgmr.msra.gmra.mxu1 %vm108_vm0, %v198_v10  ;;  %286 = vmatpush.msra.mxu2 %v1995_v40  ;;  %v2057_v57 = vld [vmem:[%s2326_s8] ss:$0 sm:$0xff] }
  0x1c   :  { %374 = vmatpush.msrb.mxu1 %v1935_v3  ;;  %312 = vmatpush.msra.mxu3 %v2009_v43 }
  0x1d   :  { %287 = vmatpush.msra.mxu2 %v2004_v42 }
  0x1e   :  { %375 = vmatpush.msrb.mxu1 %v1941_v4  ;;  %313 = vmatpush.msra.mxu3 %v2022_v46 }
  0x1f   :  { %288 = vmatpush.msra.mxu2 %v2017_v45 }
  0x20   :  { %376 = vmatpush.msrb.mxu1 %v1949_v6  ;;  %462 = vmatpush.msrb.mxu3 %v1993_v39 }
  0x21   :  { %437 = vmatpush.msrb.mxu2 %v1988_v38 }
  0x22   :  { %377 = vmatpush.msrb.mxu1 %v1958_v8  ;;  %1498 = vmatmul.msk.f32.gmra.mxu0 %vm108_vm0, %v93_v44 }
  0x23   :  { %438 = vmatpush.msrb.mxu2 %v1995_v40  ;;  %463 = vmatpush.msrb.mxu3 %v2002_v41 }
  0x24   :  { %522 = vmatpush.msra.mxu1 %v1935_v3  ;;  %1507 = vmatmul.msk.f32.vlgmr.msra.gmra.mxu2 %vm108_vm0, %v201_v49 }
  0x25   :  { %439 = vmatpush.msrb.mxu2 %v2004_v42  ;;  %464 = vmatpush.msrb.mxu3 %v2009_v43 }
  0x26   :  { %523 = vmatpush.msra.mxu1 %v1941_v4 }
  0x27   :  { %440 = vmatpush.msrb.mxu2 %v2017_v45  ;;  %465 = vmatpush.msrb.mxu3 %v2022_v46 }
  0x28   :  { %524 = vmatpush.msra.mxu1 %v1949_v6 }
  0x29   :  { %585 = vmatpush.msra.mxu2 %v1988_v38 }
  0x2a   :  { %525 = vmatpush.msra.mxu1 %v1958_v8 }
  0x2b   :  { %586 = vmatpush.msra.mxu2 %v1995_v40 }
  0x2d   :  { %587 = vmatpush.msra.mxu2 %v2004_v42 }
  0x2f   :  { %588 = vmatpush.msra.mxu2 %v2017_v45 }
  0x97   :  { %v150_v12 = vpop.f32.mrf.mxu0 }
  0x98   :  { %v225_v13 = vpop.f32.mrf.mxu1  ;;  %v151_v14 = vadd.f32 %v1978_v11, %v150_v12 }
  0x9a   :  { %v228_v15 = vadd.f32 %v225_v13, %v151_v14 }
  0x9c   :  { %1560 = vtanh.f32 %v228_v15  ;;  %v1506_v18 = vmul.f32 -1.442695, %v228_v15 }
  0x9e   :  { %1562 = vpow2.f32 %v1506_v18 }
  0x9f   :  { %v153_v52 = vpop.f32.mrf.mxu0 }
  0xa0   :  { %v154_v53 = vadd.f32 %v1978_v11, %v153_v52 }
  0xa2   :  { %v1561_v16 = vpop.eup %1560 }
  0xa3   :  { %255 = vrot.lane.b32.xlu0 %v1561_v16, %s1830_s23 }
  0xa4   :  { %v1563_v19 = vpop.eup %1562 }
  0xa5   :  { %v232_v20 = vadd.f32 1.0, %v1563_v19 }
  0xa7   :  { %1564 = vrcp.f32 %v232_v20  ;;  %v244_v26 = vand.u32 2147483648, %v232_v20  ;;  %vm238_vm2 = vweird.f32 %v232_v20  ;;  %v242_v27 = vand.u32 2147483647, %v232_v20  ;;  %v290_v56 = vpop.f32.mrf.mxu2 }
  0xa9   :  { %v245_v29 = vor.u32 1.1754944e-38, %v244_v26  ;;  %vm243_vm4 = vcmp.eq.f32.partialorder %v242_v27, 8.507059e+37 }
  0xab   :  { %250 = vrot.lane.b32.xlu0 %v199_v17, %s1830_s23 }
  0xad   :  { %v1565_v21 = vpop.eup %1564 }
  0xae   :  { %v234_v22 = vmul.f32 %v1565_v21, %v232_v20  ;;  %vm239_vm1 = vweird.f32 %v1565_v21 }
  0xaf   :  { %vm240_vm3 = vmor %vm238_vm2, %vm239_vm1 }
  0xb0   :  { %v235_v23 = vsub.f32 1.0, %v234_v22 }
  0xb2   :  { %v236_v24 = vmul.f32 %v1565_v21, %v235_v23 }
  0xb4   :  { %v237_v25 = vadd.f32 %v1565_v21, %v236_v24 }
  0xb6   :  { %v241_v28 = vsel %vm240_vm3, %v1565_v21, %v237_v25 }
  0xb7   :  { %v246_v31 = vsel %vm243_vm4, %v245_v29, %v241_v28 }
 0x115   :  { %v256_v30 = vpop.permute.xlu0 %255 }
 0x116   :  { %v258_v32 = vmul.f32 %v256_v30, %v246_v31 }
 0x118   :  { %260 = vrot.lane.b32.xlu1 %v258_v32, %s1830_s23 }
 0x11d   :  { %v251_v33 = vpop.permute.xlu0 %250 }
 0x11e   :  { %v253_v34 = vmul.f32 %v251_v33, %v246_v31 }
 0x18a   :  { %v261_v35 = vpop.permute.xlu1 %260 }
 0x18b   :  { %v1984_v36 = vadd.f32 %v261_v35, %v253_v34 }
 0x18d   :  { %1566 = vtanh.f32 %v1984_v36 }
 0x193   :  { %v1567_v37 = vpop.eup %1566 }
 0x194   :  { %266 = vrot.lane.b32.xlu1 %v1567_v37, %s1830_s23 }
 0x19c   :  { %340 = vrot.lane.b32.xlu1 %v203_v50, %s1830_s23 }
 0x206   :  { %v267_v47 = vpop.permute.xlu1 %266 }
 0x207   :  { %v269_v48 = vmul.f32 %v267_v47, %v246_v31 }
 0x209   :  { %294 = vrot.lane.b32.xlu2 %v269_v48, %s1831_s6 }
 0x20e   :  { %v341_v34 = vpop.permute.xlu1 %340 }
 0x263   :  { %v295_v51 = vpop.permute.xlu2 %294 }
 0x264   :  { %1508 = vmatmul.msk.f32.vlgmr.msra.gmra.mxu3 %vm108_vm0, %v295_v51  ;;  %1510 = vmatmul.msk.f32.vlgmr.msrb.gmra.mxu1 %vm108_vm0, %v295_v51 }
 0x265   :  { %610 = vmatpush.msra.mxu3 %v1993_v39  ;;  %670 = vmatpush.msrb.mxu1 %v1935_v3 }
 0x267   :  { %611 = vmatpush.msra.mxu3 %v2002_v41  ;;  %671 = vmatpush.msrb.mxu1 %v1941_v4 }
 0x269   :  { %612 = vmatpush.msra.mxu3 %v2009_v43  ;;  %672 = vmatpush.msrb.mxu1 %v1949_v6 }
 0x26b   :  { %613 = vmatpush.msra.mxu3 %v2022_v46  ;;  %673 = vmatpush.msrb.mxu1 %v1958_v8 }
 0x2e1   :  { %v379_v54 = vpop.f32.mrf.mxu1 }
 0x2e2   :  { %v382_v55 = vadd.f32 %v379_v54, %v154_v53 }
 0x2e4   :  { %1568 = vtanh.f32 %v382_v55  ;;  %v1511_v2 = vmul.f32 -1.442695, %v382_v55 }
 0x2e7   :  { %v315_v58 = vpop.f32.mrf.mxu3 }
 0x2e8   :  { %v316_v59 = vadd.f32 %v315_v58, %v290_v56 }
 0x2ea   :  { %v1569_v60 = vpop.eup %1568  ;;  %v318_v61 = vadd.f32 %v2057_v57, %v316_v59 }
 0x2eb   :  { %405 = vrot.lane.b32.xlu0 %v1569_v60, %s1830_s23 }
 0x2ec   :  { %1570 = vtanh.f32 %v318_v61  ;;  %v1509_v63 = vmul.f32 -1.442695, %v318_v61 }
 0x2ee   :  { %1572 = vpow2.f32 %v1509_v63 }
 0x2f2   :  { %v1571_v62 = vpop.eup %1570 }
 0x2f3   :  { %345 = vrot.lane.b32.xlu2 %v1571_v62, %s1830_s23 }
 0x2f4   :  { %v1573_v0 = vpop.eup %1572 }
 0x2f5   :  { %v322_v1 = vadd.f32 1.0, %v1573_v0 }
 0x2f7   :  { %1574 = vrcp.f32 %v322_v1  ;;  %v334_v16 = vand.u32 2147483648, %v322_v1  ;;  %vm328_vm6 = vweird.f32 %v322_v1  ;;  %v332_v17 = vand.u32 2147483647, %v322_v1 }
 0x2f8   :  { %1576 = vpow2.f32 %v1511_v2 }
 0x2f9   :  { %v335_v20 = vor.u32 1.1754944e-38, %v334_v16  ;;  %vm333_vm8 = vcmp.eq.f32.partialorder %v332_v17, 8.507059e+37 }
 0x2fd   :  { %v1575_v5 = vpop.eup %1574 }
 0x2fe   :  { %v1577_v7 = vpop.eup %1576  ;;  %v324_v9 = vmul.f32 %v1575_v5, %v322_v1  ;;  %vm329_vm5 = vweird.f32 %v1575_v5 }
 0x2ff   :  { %v386_v10 = vadd.f32 1.0, %v1577_v7  ;;  %vm330_vm7 = vmor %vm328_vm6, %vm329_vm5 }
 0x300   :  { %v325_v12 = vsub.f32 1.0, %v324_v9 }
 0x301   :  { %1578 = vrcp.f32 %v386_v10  ;;  %v398_v27 = vand.u32 2147483648, %v386_v10  ;;  %vm392_vm10 = vweird.f32 %v386_v10  ;;  %v396_v28 = vand.u32 2147483647, %v386_v10 }
 0x302   :  { %v326_v13 = vmul.f32 %v1575_v5, %v325_v12 }
 0x303   :  { %v399_v30 = vor.u32 1.1754944e-38, %v398_v27  ;;  %vm397_vm12 = vcmp.eq.f32.partialorder %v396_v28, 8.507059e+37 }
 0x304   :  { %v327_v14 = vadd.f32 %v1575_v5, %v326_v13 }
 0x306   :  { %v331_v18 = vsel %vm330_vm7, %v1575_v5, %v327_v14 }
 0x307   :  { %v1579_v15 = vpop.eup %1578  ;;  %v336_v21 = vsel %vm333_vm8, %v335_v20, %v331_v18 }
 0x308   :  { %v388_v19 = vmul.f32 %v1579_v15, %v386_v10  ;;  %vm393_vm9 = vweird.f32 %v1579_v15  ;;  %v343_v35 = vmul.f32 %v341_v34, %v336_v21 }
 0x309   :  { %vm394_vm11 = vmor %vm392_vm10, %vm393_vm9 }
 0x30a   :  { %v389_v24 = vsub.f32 1.0, %v388_v19 }
 0x30c   :  { %v390_v25 = vmul.f32 %v1579_v15, %v389_v24 }
 0x30e   :  { %v391_v26 = vadd.f32 %v1579_v15, %v390_v25 }
 0x310   :  { %v395_v29 = vsel %vm394_vm11, %v1579_v15, %v391_v26 }
 0x311   :  { %v400_v32 = vsel %vm397_vm12, %v399_v30, %v395_v29 }
 0x312   :  { %v403_v48 = vmul.f32 %v400_v32, %v1984_v36  ;;  %v94_v36 = vld [vmem:[%s2318_s0 + $0x10] sm:$0xff] }
 0x313   :  { %1499 = vmatmul.msk.f32.gmra.mxu0 %vm108_vm0, %v94_v36 }
 0x34d   :  { %v346_v22 = vpop.permute.xlu2 %345 }
 0x34e   :  { %v348_v23 = vmul.f32 %v346_v22, %v336_v21 }
 0x350   :  { %350 = vrot.lane.b32.xlu2 %v348_v23, %s1830_s23 }
 0x35d   :  { %v406_v31 = vpop.permute.xlu0 %405 }
 0x35e   :  { %v408_v33 = vmul.f32 %v406_v31, %v400_v32 }
 0x360   :  { %410 = vrot.lane.b32.xlu0 %v408_v33, %s1830_s23 }
 0x390   :  { %v156_v59 = vpop.f32.mrf.mxu0 }
 0x391   :  { %v157_v60 = vadd.f32 %v1978_v11, %v156_v59 }
 0x3aa   :  { %v351_v37 = vpop.permute.xlu2 %350 }
 0x3ab   :  { %v2064_v44 = vadd.f32 %v351_v37, %v343_v35 }
 0x3ad   :  { %1580 = vtanh.f32 %v2064_v44 }
 0x3b3   :  { %v1581_v47 = vpop.eup %1580 }
 0x3b4   :  { %356 = vrot.lane.b32.xlu1 %v1581_v47, %s1830_s23 }
 0x3d2   :  { %v411_v49 = vpop.permute.xlu0 %410 }
 0x3d3   :  { %v2069_v50 = vadd.f32 %v411_v49, %v403_v48 }
 0x3d5   :  { %1582 = vtanh.f32 %v2069_v50 }
 0x3db   :  { %v1583_v51 = vpop.eup %1582 }
 0x3dc   :  { %416 = vrot.lane.b32.xlu2 %v1583_v51, %s1830_s23 }
 0x426   :  { %v357_v52 = vpop.permute.xlu1 %356 }
 0x427   :  { %v359_v53 = vmul.f32 %v357_v52, %v336_v21 }
 0x429   :  { %421 = vrot.lane.b32.xlu0 %v359_v53, %s1831_s6 }
 0x436   :  { %v417_v54 = vpop.permute.xlu2 %416 }
 0x437   :  { %v419_v55 = vmul.f32 %v417_v54, %v400_v32 }
 0x439   :  { %446 = vrot.lane.b32.xlu1 %v419_v55, %s1831_s6 }
 0x49b   :  { %v422_v56 = vpop.permute.xlu0 %421 }
 0x49c   :  { %1512 = vmatmul.msk.f32.vlgmr.msrb.gmra.mxu2 %vm108_vm0, %v422_v56 }
 0x49d   :  { %733 = vmatpush.msrb.mxu2 %v1988_v38 }
 0x49f   :  { %734 = vmatpush.msrb.mxu2 %v1995_v40 }
 0x4a1   :  { %735 = vmatpush.msrb.mxu2 %v2004_v42 }
 0x4a3   :  { %736 = vmatpush.msrb.mxu2 %v2017_v45 }
 0x4ab   :  { %v447_v58 = vpop.permute.xlu1 %446 }
 0x4ac   :  { %1513 = vmatmul.msk.f32.vlgmr.msrb.gmra.mxu3 %vm108_vm0, %v447_v58  ;;  %1515 = vmatmul.msk.f32.vlgmr.msra.gmra.mxu1 %vm108_vm0, %v447_v58 }
 0x4ad   :  { %758 = vmatpush.msrb.mxu3 %v1993_v39  ;;  %818 = vmatpush.msra.mxu1 %v1935_v3 }
 0x4af   :  { %759 = vmatpush.msrb.mxu3 %v2002_v41  ;;  %819 = vmatpush.msra.mxu1 %v1941_v4 }
 0x4b1   :  { %760 = vmatpush.msrb.mxu3 %v2009_v43  ;;  %820 = vmatpush.msra.mxu1 %v1949_v6 }
 0x4b3   :  { %761 = vmatpush.msrb.mxu3 %v2022_v46  ;;  %821 = vmatpush.msra.mxu1 %v1958_v8 }
 0x51f   :  { %v442_v63 = vpop.f32.mrf.mxu2 }
 0x529   :  { %v527_v61 = vpop.f32.mrf.mxu1 }
 0x52a   :  { %v530_v62 = vadd.f32 %v527_v61, %v157_v60 }
 0x52c   :  { %1584 = vtanh.f32 %v530_v62  ;;  %v1516_v13 = vmul.f32 -1.442695, %v530_v62 }
 0x52f   :  { %v467_v0 = vpop.f32.mrf.mxu3 }
 0x530   :  { %v468_v1 = vadd.f32 %v467_v0, %v442_v63 }
 0x532   :  { %v1585_v2 = vpop.eup %1584  ;;  %v470_v5 = vadd.f32 %v2057_v57, %v468_v1 }
 0x533   :  { %553 = vrot.lane.b32.xlu0 %v1585_v2, %s1830_s23 }
 0x534   :  { %1586 = vtanh.f32 %v470_v5  ;;  %v1514_v9 = vmul.f32 -1.442695, %v470_v5 }
 0x536   :  { %1588 = vpow2.f32 %v1514_v9 }
 0x53a   :  { %v1587_v7 = vpop.eup %1586 }
 0x53b   :  { %493 = vrot.lane.b32.xlu2 %v1587_v7, %s1830_s23 }
 0x53c   :  { %v1589_v10 = vpop.eup %1588 }
 0x53d   :  { %v474_v12 = vadd.f32 1.0, %v1589_v10 }
 0x53f   :  { %1590 = vrcp.f32 %v474_v12  ;;  %v486_v22 = vand.u32 2147483648, %v474_v12  ;;  %vm480_vm14 = vweird.f32 %v474_v12  ;;  %v484_v23 = vand.u32 2147483647, %v474_v12 }
 0x540   :  { %1592 = vpow2.f32 %v1516_v13 }
 0x541   :  { %v487_v26 = vor.u32 1.1754944e-38, %v486_v22  ;;  %vm485_vm1 = vcmp.eq.f32.partialorder %v484_v23, 8.507059e+37 }
 0x545   :  { %v1591_v14 = vpop.eup %1590 }
 0x546   :  { %v1593_v15 = vpop.eup %1592  ;;  %v476_v16 = vmul.f32 %v1591_v14, %v474_v12  ;;  %vm481_vm13 = vweird.f32 %v1591_v14 }
 0x547   :  { %v534_v17 = vadd.f32 1.0, %v1593_v15  ;;  %vm482_vm15 = vmor %vm480_vm14, %vm481_vm13 }
 0x548   :  { %v477_v18 = vsub.f32 1.0, %v476_v16 }
 0x549   :  { %1594 = vrcp.f32 %v534_v17  ;;  %v546_v33 = vand.u32 2147483648, %v534_v17  ;;  %vm540_vm3 = vweird.f32 %v534_v17  ;;  %v544_v34 = vand.u32 2147483647, %v534_v17 }
 0x54a   :  { %v478_v19 = vmul.f32 %v1591_v14, %v477_v18 }
 0x54b   :  { %v547_v37 = vor.u32 1.1754944e-38, %v546_v33  ;;  %vm545_vm5 = vcmp.eq.f32.partialorder %v544_v34, 8.507059e+37 }
 0x54c   :  { %v479_v20 = vadd.f32 %v1591_v14, %v478_v19 }
 0x54e   :  { %v483_v24 = vsel %vm482_vm15, %v1591_v14, %v479_v20 }
 0x54f   :  { %v1595_v21 = vpop.eup %1594  ;;  %v488_v28 = vsel %vm485_vm1, %v487_v26, %v483_v24 }
 0x550   :  { %v536_v25 = vmul.f32 %v1595_v21, %v534_v17  ;;  %vm541_vm2 = vweird.f32 %v1595_v21  ;;  %v491_v54 = vmul.f32 %v488_v28, %v2064_v44  ;;  %v95_v44 = vld [vmem:[%s2318_s0 + $0x18] sm:$0xff] }
 0x551   :  { %vm542_vm4 = vmor %vm540_vm3, %vm541_vm2  ;;  %1500 = vmatmul.msk.f32.gmra.mxu0 %vm108_vm0, %v95_v44 }
 0x552   :  { %v537_v30 = vsub.f32 1.0, %v536_v25 }
 0x554   :  { %v538_v31 = vmul.f32 %v1595_v21, %v537_v30 }
 0x556   :  { %v539_v32 = vadd.f32 %v1595_v21, %v538_v31 }
 0x558   :  { %v543_v35 = vsel %vm542_vm4, %v1595_v21, %v539_v32 }
 0x559   :  { %v548_v48 = vsel %vm545_vm5, %v547_v37, %v543_v35 }
 0x55a   :  { %v551_v51 = vmul.f32 %v548_v48, %v2069_v50 }
 0x595   :  { %v494_v27 = vpop.permute.xlu2 %493 }
 0x596   :  { %v496_v29 = vmul.f32 %v494_v27, %v488_v28 }
 0x598   :  { %498 = vrot.lane.b32.xlu1 %v496_v29, %s1830_s23 }
 0x5a5   :  { %v554_v47 = vpop.permute.xlu0 %553 }
 0x5a6   :  { %v556_v49 = vmul.f32 %v554_v47, %v548_v48 }
 0x5a8   :  { %558 = vrot.lane.b32.xlu2 %v556_v49, %s1830_s23 }
 0x5ce   :  { %v159_v0 = vpop.f32.mrf.mxu0 }
 0x5cf   :  { %v160_v1 = vadd.f32 %v1978_v11, %v159_v0 }
 0x602   :  { %v559_v52 = vpop.permute.xlu2 %558 }
 0x603   :  { %v2101_v53 = vadd.f32 %v559_v52, %v551_v51 }
 0x605   :  { %1596 = vtanh.f32 %v2101_v53 }
 0x60a   :  { %v499_v55 = vpop.permute.xlu1 %498 }
 0x60b   :  { %v1597_v36 = vpop.eup %1596  ;;  %v2105_v56 = vadd.f32 %v499_v55, %v491_v54 }
 0x60c   :  { %564 = vrot.lane.b32.xlu1 %v1597_v36, %s1830_s23 }
 0x60d   :  { %1598 = vtanh.f32 %v2105_v56 }
 0x613   :  { %v1599_v58 = vpop.eup %1598 }
 0x614   :  { %504 = vrot.lane.b32.xlu0 %v1599_v58, %s1830_s23 }
 0x67e   :  { %v565_v59 = vpop.permute.xlu1 %564 }
 0x67f   :  { %v567_v50 = vmul.f32 %v565_v59, %v548_v48 }
 0x681   :  { %594 = vrot.lane.b32.xlu0 %v567_v50, %s1831_s6 }
 0x686   :  { %v505_v60 = vpop.permute.xlu0 %504 }
 0x687   :  { %v507_v61 = vmul.f32 %v505_v60, %v488_v28 }
 0x689   :  { %569 = vrot.lane.b32.xlu2 %v507_v61, %s1831_s6 }
 0x6e3   :  { %v570_v62 = vpop.permute.xlu2 %569 }
 0x6e4   :  { %1517 = vmatmul.msk.f32.vlgmr.msra.gmra.mxu2 %vm108_vm0, %v570_v62 }
 0x6e5   :  { %881 = vmatpush.msra.mxu2 %v1988_v38 }
 0x6e7   :  { %882 = vmatpush.msra.mxu2 %v1995_v40 }
 0x6e9   :  { %883 = vmatpush.msra.mxu2 %v2004_v42 }
 0x6eb   :  { %884 = vmatpush.msra.mxu2 %v2017_v45 }
 0x6f3   :  { %v595_v63 = vpop.permute.xlu0 %594 }
 0x6f4   :  { %1518 = vmatmul.msk.f32.vlgmr.msra.gmra.mxu3 %vm108_vm0, %v595_v63  ;;  %1520 = vmatmul.msk.f32.vlgmr.msrb.gmra.mxu1 %vm108_vm0, %v595_v63 }
 0x6f5   :  { %906 = vmatpush.msra.mxu3 %v1993_v39  ;;  %966 = vmatpush.msrb.mxu1 %v1935_v3 }
 0x6f7   :  { %907 = vmatpush.msra.mxu3 %v2002_v41  ;;  %967 = vmatpush.msrb.mxu1 %v1941_v4 }
 0x6f9   :  { %908 = vmatpush.msra.mxu3 %v2009_v43  ;;  %968 = vmatpush.msrb.mxu1 %v1949_v6 }
 0x6fb   :  { %909 = vmatpush.msra.mxu3 %v2022_v46  ;;  %969 = vmatpush.msrb.mxu1 %v1958_v8 }
 0x767   :  { %v590_v7 = vpop.f32.mrf.mxu2 }
 0x771   :  { %v675_v2 = vpop.f32.mrf.mxu1 }
 0x772   :  { %v678_v5 = vadd.f32 %v675_v2, %v160_v1 }
 0x774   :  { %1600 = vtanh.f32 %v678_v5  ;;  %v1521_v15 = vmul.f32 -1.442695, %v678_v5 }
 0x777   :  { %v615_v9 = vpop.f32.mrf.mxu3 }
 0x778   :  { %v616_v10 = vadd.f32 %v615_v9, %v590_v7 }
 0x77a   :  { %v1601_v12 = vpop.eup %1600  ;;  %v618_v13 = vadd.f32 %v2057_v57, %v616_v10 }
 0x77b   :  { %701 = vrot.lane.b32.xlu2 %v1601_v12, %s1830_s23 }
 0x77c   :  { %1602 = vtanh.f32 %v618_v13  ;;  %v1519_v21 = vmul.f32 -1.442695, %v618_v13 }
 0x77d   :  { %1604 = vpow2.f32 %v1521_v15 }
 0x782   :  { %v1603_v14 = vpop.eup %1602 }
 0x783   :  { %641 = vrot.lane.b32.xlu1 %v1603_v14, %s1830_s23  ;;  %v1605_v16 = vpop.eup %1604 }
 0x784   :  { %v682_v17 = vadd.f32 1.0, %v1605_v16 }
 0x786   :  { %1606 = vrcp.f32 %v682_v17  ;;  %v694_v24 = vand.u32 2147483648, %v682_v17  ;;  %vm688_vm7 = vweird.f32 %v682_v17  ;;  %v692_v25 = vand.u32 2147483647, %v682_v17 }
 0x787   :  { %1608 = vpow2.f32 %v1519_v21 }
 0x788   :  { %v695_v28 = vor.u32 1.1754944e-38, %v694_v24  ;;  %vm693_vm9 = vcmp.eq.f32.partialorder %v692_v25, 8.507059e+37 }
 0x78c   :  { %v1607_v18 = vpop.eup %1606 }
 0x78d   :  { %v684_v19 = vmul.f32 %v1607_v18, %v682_v17  ;;  %vm689_vm6 = vweird.f32 %v1607_v18  ;;  %v1609_v26 = vpop.eup %1608 }
 0x78e   :  { %vm690_vm8 = vmor %vm688_vm7, %vm689_vm6  ;;  %v622_v29 = vadd.f32 1.0, %v1609_v26 }
 0x78f   :  { %v685_v20 = vsub.f32 1.0, %v684_v19 }
 0x790   :  { %1610 = vrcp.f32 %v622_v29  ;;  %v634_v48 = vand.u32 2147483648, %v622_v29  ;;  %vm628_vm11 = vweird.f32 %v622_v29  ;;  %v632_v49 = vand.u32 2147483647, %v622_v29 }
 0x791   :  { %v686_v22 = vmul.f32 %v1607_v18, %v685_v20 }
 0x792   :  { %v635_v52 = vor.u32 1.1754944e-38, %v634_v48  ;;  %vm633_vm13 = vcmp.eq.f32.partialorder %v632_v49, 8.507059e+37 }
 0x793   :  { %v687_v23 = vadd.f32 %v1607_v18, %v686_v22 }
 0x795   :  { %v691_v27 = vsel %vm690_vm8, %v1607_v18, %v687_v23 }
 0x796   :  { %v696_v31 = vsel %vm693_vm9, %v695_v28, %v691_v27  ;;  %v1611_v33 = vpop.eup %1610 }
 0x797   :  { %v624_v34 = vmul.f32 %v1611_v33, %v622_v29  ;;  %vm629_vm10 = vweird.f32 %v1611_v33  ;;  %v699_v58 = vmul.f32 %v696_v31, %v2101_v53  ;;  %v96_v53 = vld [vmem:[%s2318_s0 + $0x20] sm:$0xff] }
 0x798   :  { %vm630_vm12 = vmor %vm628_vm11, %vm629_vm10  ;;  %1501 = vmatmul.msk.f32.gmra.mxu0 %vm108_vm0, %v96_v53 }
 0x799   :  { %v625_v35 = vsub.f32 1.0, %v624_v34 }
 0x79b   :  { %v626_v37 = vmul.f32 %v1611_v33, %v625_v35 }
 0x79d   :  { %v627_v47 = vadd.f32 %v1611_v33, %v626_v37 }
 0x79f   :  { %v631_v51 = vsel %vm630_vm12, %v1611_v33, %v627_v47 }
 0x7a0   :  { %v636_v55 = vsel %vm633_vm13, %v635_v52, %v631_v51 }
 0x7a1   :  { %v639_v61 = vmul.f32 %v636_v55, %v2105_v56 }
 0x7d5   :  { %v702_v30 = vpop.permute.xlu2 %701 }
 0x7d6   :  { %v704_v32 = vmul.f32 %v702_v30, %v696_v31 }
 0x7d8   :  { %706 = vrot.lane.b32.xlu1 %v704_v32, %s1830_s23 }
 0x7f5   :  { %v642_v54 = vpop.permute.xlu1 %641 }
 0x7f6   :  { %v644_v36 = vmul.f32 %v642_v54, %v636_v55 }
 0x7f8   :  { %646 = vrot.lane.b32.xlu0 %v644_v36, %s1830_s23 }
 0x815   :  { %v162_v9 = vpop.f32.mrf.mxu0 }
 0x816   :  { %v163_v10 = vadd.f32 %v1978_v11, %v162_v9 }
 0x84a   :  { %v707_v59 = vpop.permute.xlu1 %706 }
 0x84b   :  { %v2138_v50 = vadd.f32 %v707_v59, %v699_v58 }
 0x84d   :  { %1612 = vtanh.f32 %v2138_v50 }
 0x853   :  { %v1613_v60 = vpop.eup %1612 }
 0x854   :  { %712 = vrot.lane.b32.xlu0 %v1613_v60, %s1830_s23 }
 0x86a   :  { %v647_v44 = vpop.permute.xlu0 %646 }
 0x86b   :  { %v2143_v62 = vadd.f32 %v647_v44, %v639_v61 }
 0x86d   :  { %1614 = vtanh.f32 %v2143_v62 }
 0x873   :  { %v1615_v63 = vpop.eup %1614 }
 0x874   :  { %652 = vrot.lane.b32.xlu2 %v1615_v63, %s1830_s23 }
 0x8c6   :  { %v713_v0 = vpop.permute.xlu0 %712 }
 0x8c7   :  { %v715_v1 = vmul.f32 %v713_v0, %v696_v31 }
 0x8c9   :  { %742 = vrot.lane.b32.xlu2 %v715_v1, %s1831_s6 }
 0x8ce   :  { %v653_v2 = vpop.permute.xlu2 %652 }
 0x8cf   :  { %v655_v56 = vmul.f32 %v653_v2, %v636_v55 }
 0x8d1   :  { %717 = vrot.lane.b32.xlu1 %v655_v56, %s1831_s6 }
 0x923   :  { %v743_v5 = vpop.permute.xlu2 %742 }
 0x924   :  { %1523 = vmatmul.msk.f32.vlgmr.msrb.gmra.mxu3 %vm108_vm0, %v743_v5  ;;  %1525 = vmatmul.msk.f32.vlgmr.msra.gmra.mxu1 %vm108_vm0, %v743_v5 }
 0x925   :  { %1054 = vmatpush.msrb.mxu3 %v1993_v39  ;;  %1114 = vmatpush.msra.mxu1 %v1935_v3 }
 0x927   :  { %1055 = vmatpush.msrb.mxu3 %v2002_v41  ;;  %1115 = vmatpush.msra.mxu1 %v1941_v4 }
 0x929   :  { %1056 = vmatpush.msrb.mxu3 %v2009_v43  ;;  %1116 = vmatpush.msra.mxu1 %v1949_v6 }
 0x92b   :  { %1057 = vmatpush.msrb.mxu3 %v2022_v46  ;;  %1117 = vmatpush.msra.mxu1 %v1958_v8 }
 0x943   :  { %v718_v7 = vpop.permute.xlu1 %717 }
 0x944   :  { %1522 = vmatmul.msk.f32.vlgmr.msrb.gmra.mxu2 %vm108_vm0, %v718_v7 }
 0x945   :  { %1029 = vmatpush.msrb.mxu2 %v1988_v38 }
 0x947   :  { %1030 = vmatpush.msrb.mxu2 %v1995_v40 }
 0x949   :  { %1031 = vmatpush.msrb.mxu2 %v2004_v42 }
 0x94b   :  { %1032 = vmatpush.msrb.mxu2 %v2017_v45 }
 0x9a1   :  { %v823_v12 = vpop.f32.mrf.mxu1 }
 0x9a2   :  { %v826_v13 = vadd.f32 %v823_v12, %v163_v10  ;;  %v97_v10 = vld [vmem:[%s2318_s0 + $0x28] sm:$0xff] }
 0x9a3   :  { %1502 = vmatmul.msk.f32.gmra.mxu0 %vm108_vm0, %v97_v10 }
 0x9a4   :  { %1616 = vtanh.f32 %v826_v13  ;;  %v1526_v20 = vmul.f32 -1.442695, %v826_v13 }
 0x9a7   :  { %v763_v15 = vpop.f32.mrf.mxu3 }
 0x9aa   :  { %v1617_v14 = vpop.eup %1616 }
 0x9ab   :  { %849 = vrot.lane.b32.xlu1 %v1617_v14, %s1830_s23 }
 0x9c7   :  { %v738_v16 = vpop.f32.mrf.mxu2 }
 0x9c8   :  { %v764_v17 = vadd.f32 %v763_v15, %v738_v16 }
 0x9ca   :  { %v766_v18 = vadd.f32 %v2057_v57, %v764_v17 }
 0x9cc   :  { %1618 = vtanh.f32 %v766_v18  ;;  %v1524_v29 = vmul.f32 -1.442695, %v766_v18 }
 0x9cd   :  { %1620 = vpow2.f32 %v1526_v20 }
 0x9d2   :  { %v1619_v19 = vpop.eup %1618 }
 0x9d3   :  { %789 = vrot.lane.b32.xlu0 %v1619_v19, %s1830_s23  ;;  %v1621_v21 = vpop.eup %1620 }
 0x9d4   :  { %v830_v22 = vadd.f32 1.0, %v1621_v21 }
 0x9d6   :  { %1622 = vrcp.f32 %v830_v22  ;;  %v842_v28 = vand.u32 2147483648, %v830_v22  ;;  %vm836_vm15 = vweird.f32 %v830_v22  ;;  %v840_v30 = vand.u32 2147483647, %v830_v22 }
 0x9d7   :  { %1624 = vpow2.f32 %v1524_v29 }
 0x9d8   :  { %v843_v32 = vor.u32 1.1754944e-38, %v842_v28  ;;  %vm841_vm2 = vcmp.eq.f32.partialorder %v840_v30, 8.507059e+37 }
 0x9dc   :  { %v1623_v23 = vpop.eup %1622 }
 0x9dd   :  { %v832_v24 = vmul.f32 %v1623_v23, %v830_v22  ;;  %vm837_vm14 = vweird.f32 %v1623_v23  ;;  %v1625_v37 = vpop.eup %1624 }
 0x9de   :  { %vm838_vm1 = vmor %vm836_vm15, %vm837_vm14  ;;  %v770_v47 = vadd.f32 1.0, %v1625_v37 }
 0x9df   :  { %v833_v25 = vsub.f32 1.0, %v832_v24 }
 0x9e0   :  { %1626 = vrcp.f32 %v770_v47  ;;  %v782_v55 = vand.u32 2147483648, %v770_v47  ;;  %vm776_vm4 = vweird.f32 %v770_v47  ;;  %v780_v36 = vand.u32 2147483647, %v770_v47 }
 0x9e1   :  { %v834_v26 = vmul.f32 %v1623_v23, %v833_v25 }
 0x9e2   :  { %v783_v59 = vor.u32 1.1754944e-38, %v782_v55  ;;  %vm781_vm6 = vcmp.eq.f32.partialorder %v780_v36, 8.507059e+37 }
 0x9e3   :  { %v835_v27 = vadd.f32 %v1623_v23, %v834_v26 }
 0x9e5   :  { %v839_v31 = vsel %vm838_vm1, %v1623_v23, %v835_v27 }
 0x9e6   :  { %v844_v34 = vsel %vm841_vm2, %v843_v32, %v839_v31  ;;  %v1627_v48 = vpop.eup %1626 }
 0x9e7   :  { %v772_v49 = vmul.f32 %v1627_v48, %v770_v47  ;;  %vm777_vm3 = vweird.f32 %v1627_v48  ;;  %v847_v63 = vmul.f32 %v844_v34, %v2138_v50 }
 0x9e8   :  { %vm778_vm5 = vmor %vm776_vm4, %vm777_vm3 }
 0x9e9   :  { %v773_v51 = vsub.f32 1.0, %v772_v49 }
 0x9eb   :  { %v774_v52 = vmul.f32 %v1627_v48, %v773_v51 }
 0x9ed   :  { %v775_v54 = vadd.f32 %v1627_v48, %v774_v52 }
 0x9ef   :  { %v779_v58 = vsel %vm778_vm5, %v1627_v48, %v775_v54 }
 0x9f0   :  { %v784_v61 = vsel %vm781_vm6, %v783_v59, %v779_v58 }
 0x9f1   :  { %v787_v2 = vmul.f32 %v784_v61, %v2143_v62 }
 0xa1d   :  { %v850_v33 = vpop.permute.xlu1 %849 }
 0xa1e   :  { %v852_v35 = vmul.f32 %v850_v33, %v844_v34 }
 0xa20   :  { %854 = vrot.lane.b32.xlu0 %v852_v35, %s1830_s23 }
 0xa45   :  { %v790_v60 = vpop.permute.xlu0 %789 }
 0xa46   :  { %v792_v44 = vmul.f32 %v790_v60, %v784_v61 }
 0xa48   :  { %794 = vrot.lane.b32.xlu2 %v792_v44, %s1830_s23 }
 0xa92   :  { %v855_v53 = vpop.permute.xlu0 %854 }
 0xa93   :  { %v2175_v0 = vadd.f32 %v855_v53, %v847_v63 }
 0xa95   :  { %1628 = vtanh.f32 %v2175_v0 }
 0xa9b   :  { %v1629_v1 = vpop.eup %1628 }
 0xa9c   :  { %860 = vrot.lane.b32.xlu2 %v1629_v1, %s1830_s23 }
 0xaa2   :  { %v795_v56 = vpop.permute.xlu2 %794 }
 0xaa3   :  { %v2180_v5 = vadd.f32 %v795_v56, %v787_v2 }
 0xaa5   :  { %1630 = vtanh.f32 %v2180_v5 }
 0xaab   :  { %v1631_v7 = vpop.eup %1630 }
 0xaac   :  { %800 = vrot.lane.b32.xlu1 %v1631_v7, %s1830_s23 }
 0xaf6   :  { %v861_v9 = vpop.permute.xlu2 %860 }
 0xaf7   :  { %v863_v50 = vmul.f32 %v861_v9, %v844_v34  ;;  %v98_v9 = vld [vmem:[%s2318_s0 + $0x30] sm:$0xff] }
 0xaf8   :  { %1503 = vmatmul.msk.f32.gmra.mxu0 %vm108_vm0, %v98_v9 }
 0xaf9   :  { %890 = vrot.lane.b32.xlu1 %v863_v50, %s1831_s6 }
 0xb1e   :  { %v801_v12 = vpop.permute.xlu1 %800 }
 0xb1f   :  { %v803_v62 = vmul.f32 %v801_v12, %v784_v61 }
 0xb21   :  { %865 = vrot.lane.b32.xlu0 %v803_v62, %s1831_s6  ;;  %v1692_v62 = vld [vmem:[#allocation9 + $0x18] sm:$0xff] }
 0xb6b   :  { %v891_v13 = vpop.permute.xlu1 %890 }
 0xb6c   :  { %1528 = vmatmul.msk.f32.vlgmr.msra.gmra.mxu3 %vm108_vm0, %v891_v13  ;;  %1530 = vmatmul.msk.f32.vlgmr.msrb.gmra.mxu1 %vm108_vm0, %v891_v13  ;;  %v1693_v13 = vld [vmem:[#allocation9 + $0x10] sm:$0xff] }
 0xb6d   :  { %1202 = vmatpush.msra.mxu3 %v1993_v39  ;;  %1262 = vmatpush.msrb.mxu1 %v1935_v3  ;;  %v165_v3 = vpop.f32.mrf.mxu0 }
 0xb6f   :  { %1203 = vmatpush.msra.mxu3 %v2002_v41  ;;  %1263 = vmatpush.msrb.mxu1 %v1941_v4  ;;  %v166_v4 = vadd.f32 %v1978_v11, %v165_v3 }
 0xb71   :  { %1204 = vmatpush.msra.mxu3 %v2009_v43  ;;  %1264 = vmatpush.msrb.mxu1 %v1949_v6 }
 0xb73   :  { %1205 = vmatpush.msra.mxu3 %v2022_v46  ;;  %1265 = vmatpush.msrb.mxu1 %v1958_v8 }
 0xb75   :  { %v168_v3 = vpop.f32.mrf.mxu0 }
 0xb93   :  { %v866_v14 = vpop.permute.xlu0 %865 }
 0xb94   :  { %1527 = vmatmul.msk.f32.vlgmr.msra.gmra.mxu2 %vm108_vm0, %v866_v14  ;;  %v1694_v14 = vld [vmem:[#allocation9 + $0x8] sm:$0xff] }
 0xb95   :  { %1177 = vmatpush.msra.mxu2 %v1988_v38 }
 0xb97   :  { %1178 = vmatpush.msra.mxu2 %v1995_v40 }
 0xb99   :  { %1179 = vmatpush.msra.mxu2 %v2004_v42 }
 0xb9b   :  { %1180 = vmatpush.msra.mxu2 %v2017_v45 }
 0xbe9   :  { %v971_v15 = vpop.f32.mrf.mxu1 }
 0xbea   :  { %v974_v6 = vadd.f32 %v971_v15, %v166_v4 }
 0xbec   :  { %1632 = vtanh.f32 %v974_v6  ;;  %v1531_v42 = vmul.f32 -1.442695, %v974_v6 }
 0xbef   :  { %v911_v8 = vpop.f32.mrf.mxu3 }
 0xbf2   :  { %v1633_v16 = vpop.eup %1632 }
 0xbf3   :  { %997 = vrot.lane.b32.xlu0 %v1633_v16, %s1830_s23 }
 0xc17   :  { %v886_v17 = vpop.f32.mrf.mxu2 }
 0xc18   :  { %v912_v18 = vadd.f32 %v911_v8, %v886_v17 }
 0xc1a   :  { %v914_v38 = vadd.f32 %v2057_v57, %v912_v18 }
 0xc1c   :  { %1634 = vtanh.f32 %v914_v38  ;;  %v1529_v21 = vmul.f32 -1.442695, %v914_v38 }
 0xc1d   :  { %1636 = vpow2.f32 %v1531_v42 }
 0xc22   :  { %v1635_v40 = vpop.eup %1634 }
 0xc23   :  { %937 = vrot.lane.b32.xlu2 %v1635_v40, %s1830_s23  ;;  %v1637_v19 = vpop.eup %1636 }
 0xc24   :  { %v978_v20 = vadd.f32 1.0, %v1637_v19 }
 0xc26   :  { %1638 = vrcp.f32 %v978_v20  ;;  %v990_v28 = vand.u32 2147483648, %v978_v20  ;;  %vm984_vm8 = vweird.f32 %v978_v20  ;;  %v988_v29 = vand.u32 2147483647, %v978_v20 }
 0xc27   :  { %1640 = vpow2.f32 %v1529_v21 }
 0xc28   :  { %v991_v31 = vor.u32 1.1754944e-38, %v990_v28  ;;  %vm989_vm10 = vcmp.eq.f32.partialorder %v988_v29, 8.507059e+37 }
 0xc2c   :  { %v1639_v11 = vpop.eup %1638 }
 0xc2d   :  { %v980_v22 = vmul.f32 %v1639_v11, %v978_v20  ;;  %v1641_v24 = vpop.eup %1640  ;;  %vm985_vm7 = vweird.f32 %v1639_v11 }
 0xc2e   :  { %v918_v26 = vadd.f32 1.0, %v1641_v24  ;;  %vm986_vm9 = vmor %vm984_vm8, %vm985_vm7 }
 0xc2f   :  { %v981_v23 = vsub.f32 1.0, %v980_v22 }
 0xc30   :  { %1642 = vrcp.f32 %v918_v26  ;;  %v930_v51 = vand.u32 2147483648, %v918_v26  ;;  %vm924_vm12 = vweird.f32 %v918_v26  ;;  %v928_v52 = vand.u32 2147483647, %v918_v26 }
 0xc31   :  { %v982_v25 = vmul.f32 %v1639_v11, %v981_v23 }
 0xc32   :  { %v931_v55 = vor.u32 1.1754944e-38, %v930_v51  ;;  %vm929_vm14 = vcmp.eq.f32.partialorder %v928_v52, 8.507059e+37 }
 0xc33   :  { %v983_v27 = vadd.f32 %v1639_v11, %v982_v25 }
 0xc35   :  { %v987_v30 = vsel %vm986_vm9, %v1639_v11, %v983_v27 }
 0xc36   :  { %v992_v33 = vsel %vm989_vm10, %v991_v31, %v987_v30  ;;  %v1643_v35 = vpop.eup %1642 }
 0xc37   :  { %v920_v37 = vmul.f32 %v1643_v35, %v918_v26  ;;  %vm925_vm11 = vweird.f32 %v1643_v35  ;;  %v995_v60 = vmul.f32 %v992_v33, %v2175_v0 }
 0xc38   :  { %vm926_vm13 = vmor %vm924_vm12, %vm925_vm11 }
 0xc39   :  { %v921_v47 = vsub.f32 1.0, %v920_v37 }
 0xc3b   :  { %v922_v48 = vmul.f32 %v1643_v35, %v921_v47 }
 0xc3d   :  { %v923_v49 = vadd.f32 %v1643_v35, %v922_v48 }
 0xc3f   :  { %v927_v54 = vsel %vm926_vm13, %v1643_v35, %v923_v49 }
 0xc40   :  { %v932_v58 = vsel %vm929_vm14, %v931_v55, %v927_v54 }
 0xc41   :  { %v935_v53 = vmul.f32 %v932_v58, %v2180_v5 }
 0xc65   :  { %v998_v32 = vpop.permute.xlu0 %997 }
 0xc66   :  { %v1000_v34 = vmul.f32 %v998_v32, %v992_v33 }
 0xc68   :  { %1002 = vrot.lane.b32.xlu2 %v1000_v34, %s1830_s23 }
 0xc7d   :  { %v938_v36 = vpop.permute.xlu2 %937 }
 0xc7e   :  { %v940_v59 = vmul.f32 %v938_v36, %v932_v58 }
 0xc80   :  { %942 = vrot.lane.b32.xlu1 %v940_v59, %s1830_s23 }
 0xcc2   :  { %v1003_v61 = vpop.permute.xlu2 %1002 }
 0xcc3   :  { %v2212_v44 = vadd.f32 %v1003_v61, %v995_v60 }
 0xcc5   :  { %1644 = vtanh.f32 %v2212_v44 }
 0xccb   :  { %v1645_v63 = vpop.eup %1644 }
 0xccc   :  { %1008 = vrot.lane.b32.xlu1 %v1645_v63, %s1830_s23 }
 0xcf2   :  { %v943_v1 = vpop.permute.xlu1 %942 }
 0xcf3   :  { %v2217_v2 = vadd.f32 %v943_v1, %v935_v53  ;;  %v99_v1 = vld [vmem:[%s2318_s0 + $0x38] sm:$0xff] }
 0xcf4   :  { %1504 = vmatmul.msk.f32.gmra.mxu0 %vm108_vm0, %v99_v1 }
 0xcf5   :  { %1646 = vtanh.f32 %v2217_v2 }
 0xcfb   :  { %v1647_v56 = vpop.eup %1646 }
 0xcfc   :  { %948 = vrot.lane.b32.xlu0 %v1647_v56, %s1830_s23 }
 0xd3e   :  { %v1009_v7 = vpop.permute.xlu1 %1008 }
 0xd3f   :  { %v1011_v0 = vmul.f32 %v1009_v7, %v992_v33 }
 0xd41   :  { %1038 = vrot.lane.b32.xlu0 %v1011_v0, %s1831_s6 }
 0xd6e   :  { %v949_v50 = vpop.permute.xlu0 %948 }
 0xd6f   :  { %v951_v5 = vmul.f32 %v949_v50, %v932_v58 }
 0xd71   :  { %1013 = vrot.lane.b32.xlu2 %v951_v5, %s1831_s6  ;;  %v171_v9 = vpop.f32.mrf.mxu0 }
 0xdb3   :  { %v1039_v10 = vpop.permute.xlu0 %1038 }
 0xdb4   :  { %1533 = vmatmul.msk.f32.vlgmr.msrb.gmra.mxu3 %vm108_vm0, %v1039_v10  ;;  %1535 = vmatmul.msk.f32.vlgmr.msra.gmra.mxu1 %vm108_vm0, %v1039_v10 }
 0xdb5   :  { %1350 = vmatpush.msrb.mxu3 %v1993_v39  ;;  %v2238_v39 = vld [vmem:[%s2323_s5] ss:$0 sm:$0xff] }
 0xdb6   :  { %v172_v50 = vadd.f32 %v2238_v39, %v171_v9 }
 0xdb7   :  { %1351 = vmatpush.msrb.mxu3 %v2002_v41  ;;  %v169_v41 = vadd.f32 %v2238_v39, %v168_v3  ;;  %v2270_v3 = vld [vmem:[%s2326_s8] ss:$0 sm:$0xff] }
 0xdb9   :  { %1352 = vmatpush.msrb.mxu3 %v2009_v43 }
 0xdbb   :  { %1353 = vmatpush.msrb.mxu3 %v2022_v46 }
 0xdcb   :  { %v1014_v12 = vpop.permute.xlu2 %1013 }
 0xdcc   :  { %1532 = vmatmul.msk.f32.vlgmr.msrb.gmra.mxu2 %vm108_vm0, %v1014_v12 }
 0xdcd   :  { %1325 = vmatpush.msrb.mxu2 %v1692_v62 }
 0xdcf   :  { %1326 = vmatpush.msrb.mxu2 %v1693_v13 }
 0xdd1   :  { %1327 = vmatpush.msrb.mxu2 %v1694_v14 }
 0xdd3   :  { %1328 = vmatpush.msrb.mxu2 %v2017_v45 }
 0xe31   :  { %v1119_v43 = vpop.f32.mrf.mxu1 }
 0xe32   :  { %v1122_v46 = vadd.f32 %v1119_v43, %v169_v41 }
 0xe34   :  { %1648 = vtanh.f32 %v1122_v46  ;;  %v1536_v17 = vmul.f32 -1.442695, %v1122_v46 }
 0xe37   :  { %v1059_v15 = vpop.f32.mrf.mxu3 }
 0xe3a   :  { %v1649_v4 = vpop.eup %1648 }
 0xe3b   :  { %1145 = vrot.lane.b32.xlu2 %v1649_v4, %s1830_s23 }
 0xe4f   :  { %v1034_v6 = vpop.f32.mrf.mxu2 }
 0xe50   :  { %v1060_v16 = vadd.f32 %v1059_v15, %v1034_v6 }
 0xe52   :  { %v1062_v8 = vadd.f32 %v2057_v57, %v1060_v16 }
 0xe54   :  { %1650 = vtanh.f32 %v1062_v8  ;;  %v1534_v27 = vmul.f32 -1.442695, %v1062_v8 }
 0xe55   :  { %1652 = vpow2.f32 %v1536_v17 }
 0xe5a   :  { %v1651_v45 = vpop.eup %1650 }
 0xe5b   :  { %1085 = vrot.lane.b32.xlu1 %v1651_v45, %s1830_s23  ;;  %v1653_v18 = vpop.eup %1652 }
 0xe5c   :  { %v1126_v38 = vadd.f32 1.0, %v1653_v18 }
 0xe5e   :  { %1654 = vrcp.f32 %v1126_v38  ;;  %v1138_v21 = vand.u32 2147483648, %v1126_v38  ;;  %vm1132_vm1 = vweird.f32 %v1126_v38  ;;  %v1136_v22 = vand.u32 2147483647, %v1126_v38 }
 0xe5f   :  { %1656 = vpow2.f32 %v1534_v27 }
 0xe60   :  { %v1139_v23 = vor.u32 1.1754944e-38, %v1138_v21  ;;  %vm1137_vm3 = vcmp.eq.f32.partialorder %v1136_v22, 8.507059e+37 }
 0xe64   :  { %v1655_v40 = vpop.eup %1654 }
 0xe65   :  { %v1128_v42 = vmul.f32 %v1655_v40, %v1126_v38  ;;  %vm1133_vm15 = vweird.f32 %v1655_v40  ;;  %v1657_v28 = vpop.eup %1656 }
 0xe66   :  { %vm1134_vm2 = vmor %vm1132_vm1, %vm1133_vm15  ;;  %v1066_v29 = vadd.f32 1.0, %v1657_v28 }
 0xe67   :  { %v1129_v19 = vsub.f32 1.0, %v1128_v42 }
 0xe68   :  { %1658 = vrcp.f32 %v1066_v29  ;;  %v1078_v35 = vand.u32 2147483648, %v1066_v29  ;;  %vm1072_vm5 = vweird.f32 %v1066_v29  ;;  %v1076_v37 = vand.u32 2147483647, %v1066_v29 }
 0xe69   :  { %v1130_v20 = vmul.f32 %v1655_v40, %v1129_v19 }
 0xe6a   :  { %v1079_v48 = vor.u32 1.1754944e-38, %v1078_v35  ;;  %vm1077_vm7 = vcmp.eq.f32.partialorder %v1076_v37, 8.507059e+37 }
 0xe6b   :  { %v1131_v11 = vadd.f32 %v1655_v40, %v1130_v20 }
 0xe6d   :  { %v1135_v57 = vsel %vm1134_vm2, %v1655_v40, %v1131_v11 }
 0xe6e   :  { %v1140_v25 = vsel %vm1137_vm3, %v1139_v23, %v1135_v57  ;;  %v1659_v30 = vpop.eup %1658 }
 0xe6f   :  { %v1068_v31 = vmul.f32 %v1659_v30, %v1066_v29  ;;  %vm1073_vm4 = vweird.f32 %v1659_v30  ;;  %v1143_v54 = vmul.f32 %v1140_v25, %v2212_v44 }
 0xe70   :  { %vm1074_vm6 = vmor %vm1072_vm5, %vm1073_vm4 }
 0xe71   :  { %v1069_v32 = vsub.f32 1.0, %v1068_v31 }
 0xe73   :  { %v1070_v33 = vmul.f32 %v1659_v30, %v1069_v32 }
 0xe75   :  { %v1071_v34 = vadd.f32 %v1659_v30, %v1070_v33 }
 0xe77   :  { %v1075_v47 = vsel %vm1074_vm6, %v1659_v30, %v1071_v34  ;;  %vm1434_vm6 = vcmask 7168  }
 0xe78   :  { %v1080_v51 = vsel %vm1077_vm7, %v1079_v48, %v1075_v47 }
 0xe79   :  { %v1083_v59 = vmul.f32 %v1080_v51, %v2217_v2 }
 0xe95   :  { %v1146_v24 = vpop.permute.xlu2 %1145 }
 0xe96   :  { %v1148_v26 = vmul.f32 %v1146_v24, %v1140_v25 }
 0xe98   :  { %1150 = vrot.lane.b32.xlu1 %v1148_v26, %s1830_s23 }
 0xecd   :  { %v1086_v49 = vpop.permute.xlu1 %1085 }
 0xece   :  { %v1088_v52 = vmul.f32 %v1086_v49, %v1080_v51 }
 0xed0   :  { %1090 = vrot.lane.b32.xlu0 %v1088_v52, %s1830_s23 }
 0xf0a   :  { %v1151_v55 = vpop.permute.xlu1 %1150 }
 0xf0b   :  { %v2247_v36 = vadd.f32 %v1151_v55, %v1143_v54 }
 0xf0d   :  { %1660 = vtanh.f32 %v2247_v36 }
 0xf13   :  { %v1661_v58 = vpop.eup %1660 }
 0xf14   :  { %1156 = vrot.lane.b32.xlu0 %v1661_v58, %s1830_s23 }
 0xf42   :  { %v1091_v60 = vpop.permute.xlu0 %1090 }
 0xf43   :  { %v2252_v61 = vadd.f32 %v1091_v60, %v1083_v59 }
 0xf45   :  { %1662 = vtanh.f32 %v2252_v61 }
 0xf4b   :  { %v1663_v63 = vpop.eup %1662 }
 0xf4c   :  { %1096 = vrot.lane.b32.xlu2 %v1663_v63, %s1830_s23 }
 0xf86   :  { %v1157_v53 = vpop.permute.xlu0 %1156 }
 0xf87   :  { %v1159_v44 = vmul.f32 %v1157_v53, %v1140_v25 }
 0xf89   :  { %1186 = vrot.lane.b32.xlu2 %v1159_v44, %s1831_s6 }
 0xfa6   :  { %v1097_v56 = vpop.permute.xlu2 %1096 }
 0xfa7   :  { %v1099_v2 = vmul.f32 %v1097_v56, %v1080_v51 }
 0xfa9   :  { %1161 = vrot.lane.b32.xlu1 %v1099_v2, %s1831_s6 }
 0xfe3   :  { %v1187_v7 = vpop.permute.xlu2 %1186 }
 0xfe4   :  { %1538 = vmatmul.msk.f32.vlgmr.msra.gmra.mxu3 %vm108_vm0, %v1187_v7  ;;  %1540 = vmatmul.msk.f32.vlgmr.msrb.gmra.mxu1 %vm108_vm0, %v1187_v7 }
0x101b   :  { %v1162_v0 = vpop.permute.xlu1 %1161 }
0x101c   :  { %1537 = vmatmul.msk.f32.vlgmr.msra.gmra.mxu2 %vm108_vm0, %v1162_v0 }
0x1061   :  { %v1267_v5 = vpop.f32.mrf.mxu1 }
0x1062   :  { %v1270_v10 = vadd.f32 %v1267_v5, %v172_v50 }
0x1064   :  { %1664 = vtanh.f32 %v1270_v10  ;;  %v1541_v39 = vmul.f32 -1.442695, %v1270_v10 }
0x1067   :  { %v1207_v62 = vpop.f32.mrf.mxu3 }
0x106a   :  { %v1665_v12 = vpop.eup %1664 }
0x106b   :  { %1293 = vrot.lane.b32.xlu1 %v1665_v12, %s1830_s23 }
0x109f   :  { %v1182_v13 = vpop.f32.mrf.mxu2 }
0x10a0   :  { %v1208_v14 = vadd.f32 %v1207_v62, %v1182_v13 }
0x10a2   :  { %v1210_v41 = vadd.f32 %v2270_v3, %v1208_v14 }
0x10a4   :  { %1666 = vtanh.f32 %v1210_v41  ;;  %v1539_v11 = vmul.f32 -1.442695, %v1210_v41 }
0x10a5   :  { %1668 = vpow2.f32 %v1541_v39  ;;  %v1558_v39 = vld [vmem:[%s2327_s9] ss:$0 sm:$0xff]  ;;  %s1833_s9 = smov [#allocation10]  }
0x10aa   :  { %v1667_v43 = vpop.eup %1666 }
0x10ab   :  { %1233 = vrot.lane.b32.xlu0 %v1667_v43, %s1830_s23  ;;  %v1669_v46 = vpop.eup %1668 }
0x10ac   :  { %v1274_v4 = vadd.f32 1.0, %v1669_v46 }
0x10ae   :  { %1670 = vrcp.f32 %v1274_v4  ;;  %v1286_v17 = vand.u32 2147483648, %v1274_v4  ;;  %vm1280_vm9 = vweird.f32 %v1274_v4  ;;  %v1284_v18 = vand.u32 2147483647, %v1274_v4 }
0x10af   :  { %1672 = vpow2.f32 %v1539_v11 }
0x10b0   :  { %v1287_v40 = vor.u32 1.1754944e-38, %v1286_v17  ;;  %vm1285_vm11 = vcmp.eq.f32.partialorder %v1284_v18, 8.507059e+37 }
0x10b4   :  { %v1671_v15 = vpop.eup %1670 }
0x10b5   :  { %v1276_v6 = vmul.f32 %v1671_v15, %v1274_v4  ;;  %vm1281_vm8 = vweird.f32 %v1671_v15  ;;  %v1673_v21 = vpop.eup %1672 }
0x10b6   :  { %vm1282_vm10 = vmor %vm1280_vm9, %vm1281_vm8  ;;  %v1214_v22 = vadd.f32 1.0, %v1673_v21 }
0x10b7   :  { %v1277_v16 = vsub.f32 1.0, %v1276_v6 }
0x10b8   :  { %1674 = vrcp.f32 %v1214_v22  ;;  %v1226_v27 = vand.u32 2147483648, %v1214_v22  ;;  %vm1220_vm13 = vweird.f32 %v1214_v22  ;;  %v1224_v28 = vand.u32 2147483647, %v1214_v22 }
0x10b9   :  { %v1278_v8 = vmul.f32 %v1671_v15, %v1277_v16 }
0x10ba   :  { %v1227_v30 = vor.u32 1.1754944e-38, %v1226_v27  ;;  %vm1225_vm15 = vcmp.eq.f32.partialorder %v1224_v28, 8.507059e+37 }
0x10bb   :  { %v1279_v45 = vadd.f32 %v1671_v15, %v1278_v8 }
0x10bd   :  { %v1283_v38 = vsel %vm1282_vm10, %v1671_v15, %v1279_v45 }
0x10be   :  { %v1288_v19 = vsel %vm1285_vm11, %v1287_v40, %v1283_v38  ;;  %v1675_v57 = vpop.eup %1674 }
0x10bf   :  { %v1216_v23 = vmul.f32 %v1675_v57, %v1214_v22  ;;  %vm1221_vm12 = vweird.f32 %v1675_v57  ;;  %v1291_v34 = vmul.f32 %v1288_v19, %v2247_v36 }
0x10c0   :  { %vm1222_vm14 = vmor %vm1220_vm13, %vm1221_vm12 }
0x10c1   :  { %v1217_v24 = vsub.f32 1.0, %v1216_v23 }
0x10c3   :  { %v1218_v25 = vmul.f32 %v1675_v57, %v1217_v24 }
0x10c5   :  { %v1219_v26 = vadd.f32 %v1675_v57, %v1218_v25 }
0x10c7   :  { %v1223_v29 = vsel %vm1222_vm14, %v1675_v57, %v1219_v26 }
0x10c8   :  { %v1228_v32 = vsel %vm1225_vm15, %v1227_v30, %v1223_v29 }
0x10c9   :  { %v1231_v48 = vmul.f32 %v1228_v32, %v2252_v61 }
0x10dd   :  { %v1294_v42 = vpop.permute.xlu1 %1293 }
0x10de   :  { %v1296_v20 = vmul.f32 %v1294_v42, %v1288_v19 }
0x10e0   :  { %1298 = vrot.lane.b32.xlu0 %v1296_v20, %s1830_s23  ;;  %v1559_v20 = vld [vmem:[#allocation3] ss:$0 sm:$0xff] }
0x111d   :  { %v1234_v31 = vpop.permute.xlu0 %1233 }
0x111e   :  { %v1236_v33 = vmul.f32 %v1234_v31, %v1228_v32 }
0x1120   :  { %1238 = vrot.lane.b32.xlu2 %v1236_v33, %s1830_s23 }
0x1152   :  { %v1299_v35 = vpop.permute.xlu0 %1298 }
0x1153   :  { %v2277_v37 = vadd.f32 %v1299_v35, %v1291_v34 }
0x1155   :  { %1676 = vtanh.f32 %v2277_v37 }
0x115b   :  { %v1677_v47 = vpop.eup %1676 }
0x115c   :  { %1304 = vrot.lane.b32.xlu2 %v1677_v47, %s1830_s23 }
0x117a   :  { %v1239_v49 = vpop.permute.xlu2 %1238 }
0x117b   :  { %v1241_v51 = vadd.f32 %v1239_v49, %v1231_v48 }
0x117d   :  { %1678 = vtanh.f32 %v1241_v51 }
0x1183   :  { %v1679_v52 = vpop.eup %1678 }
0x1184   :  { %1244 = vrot.lane.b32.xlu1 %v1679_v52, %s1830_s23 }
0x11b6   :  { %v1305_v54 = vpop.permute.xlu2 %1304 }
0x11b7   :  { %v1307_v55 = vmul.f32 %v1305_v54, %v1288_v19 }
0x11b9   :  { %1334 = vrot.lane.b32.xlu1 %v1307_v55, %s1831_s6 }
0x11f6   :  { %v1245_v36 = vpop.permute.xlu1 %1244 }
0x11f7   :  { %v1247_v58 = vmul.f32 %v1245_v36, %v1228_v32 }
0x11f9   :  { %1309 = vrot.lane.b32.xlu0 %v1247_v58, %s1831_s6 }
0x122b   :  { %v1335_v59 = vpop.permute.xlu1 %1334 }
0x122c   :  { %1437 = vst.msk [vmem:[#allocation10] sm:$0xff] %vm108_vm0, %v1335_v59  ;;  %1543 = vmatmul.msk.f32.vlgmr.msrb.gmra.mxu3 %vm108_vm0, %v1335_v59 }
0x126b   :  { %v1310_v60 = vpop.permute.xlu0 %1309 }
0x126c   :  { %1542 = vmatmul.msk.f32.vlgmr.msrb.gmra.mxu2 %vm108_vm0, %v1310_v60 }
0x12af   :  { %v1355_v61 = vpop.f32.mrf.mxu3 }
0x12ef   :  { %v1330_v63 = vpop.f32.mrf.mxu2 }
0x12f0   :  { %v1356_v53 = vadd.f32 %v1355_v61, %v1330_v63 }
0x12f2   :  { %v1358_v44 = vadd.f32 %v2270_v3, %v1356_v53 }
0x12f4   :  { %1680 = vtanh.f32 %v1358_v44  ;;  %v1544_v56 = vmul.f32 -1.442695, %v1358_v44 }
0x12f6   :  { %1682 = vpow2.f32 %v1544_v56 }
0x12fa   :  { %v1681_v1 = vpop.eup %1680 }
0x12fb   :  { %1381 = vrot.lane.b32.xlu2 %v1681_v1, %s1830_s23 }
0x12fc   :  { %v1683_v2 = vpop.eup %1682 }
0x12fd   :  { %v1362_v7 = vadd.f32 1.0, %v1683_v2 }
0x12ff   :  { %1684 = vrcp.f32 %v1362_v7  ;;  %v1374_v12 = vand.u32 2147483648, %v1362_v7  ;;  %vm1368_vm2 = vweird.f32 %v1362_v7  ;;  %v1372_v62 = vand.u32 2147483647, %v1362_v7 }
0x1301   :  { %v1375_v14 = vor.u32 1.1754944e-38, %v1374_v12  ;;  %vm1373_vm4 = vcmp.eq.f32.partialorder %v1372_v62, 8.507059e+37 }
0x1303   :  { %1399 = vrot.lane.b32.xlu2 %v1558_v39, %s1831_s6 }
0x1305   :  { %v1685_v0 = vpop.eup %1684 }
0x1306   :  { %v1364_v9 = vmul.f32 %v1685_v0, %v1362_v7  ;;  %vm1369_vm1 = vweird.f32 %v1685_v0 }
0x1307   :  { %vm1370_vm3 = vmor %vm1368_vm2, %vm1369_vm1 }
0x1308   :  { %v1365_v50 = vsub.f32 1.0, %v1364_v9 }
0x130a   :  { %v1366_v5 = vmul.f32 %v1685_v0, %v1365_v50 }
0x130c   :  { %v1367_v10 = vadd.f32 %v1685_v0, %v1366_v5 }
0x130e   :  { %v1371_v13 = vsel %vm1370_vm3, %v1685_v0, %v1367_v10 }
0x130f   :  { %v1376_v41 = vsel %vm1373_vm4, %v1375_v14, %v1371_v13 }
0x1310   :  { %v1379_v46 = vmul.f32 %v1376_v41, %v1241_v51 }
0x1355   :  { %v1382_v3 = vpop.permute.xlu2 %1381 }
0x1356   :  { %v1384_v43 = vmul.f32 %v1382_v3, %v1376_v41 }
0x1358   :  { %1386 = vrot.lane.b32.xlu0 %v1384_v43, %s1830_s23 }
0x135d   :  { %v1400_v8 = vpop.permute.xlu2 %1399 }
0x13ca   :  { %v1387_v4 = vpop.permute.xlu0 %1386 }
0x13cb   :  { %v1389_v15 = vadd.f32 %v1387_v4, %v1379_v46 }
0x13cd   :  { %1686 = vtanh.f32 %v1389_v15 }
0x13d3   :  { %v1687_v6 = vpop.eup %1686 }
0x13d4   :  { %1392 = vrot.lane.b32.xlu1 %v1687_v6, %s1830_s23  ;;  %s1461_s23 = sshll.u32 %s1833_s9, 4  ;;  %s1462_s23 = int_to_ptr.vmem [resolvable:$true] %s1461_s23 }
0x1446   :  { %v1393_v16 = vpop.permute.xlu1 %1392 }
0x1447   :  { %v1395_v45 = vmul.f32 %v1393_v16, %v1376_v41 }
0x1449   :  { %v1402_v17 = vmul.f32 %v1400_v8, %v1395_v45  ;;  %1439 = vrot.lane.b32.xlu2 %v1395_v45, %s1831_s6 }
0x144b   :  { %1404 = vrot.lane.b32.xlu0 %v1402_v17, %s1831_s6  ;;  %s1463_s6 = sshll.u32 %s2330_s12, 4  ;;  %s1464_s6 = int_to_ptr.hbm [resolvable:$true] %s1463_s6 }
0x1451   :  { %1450 = vrot.lane.b32.xlu2 %v1389_v15, %s1832_s30 }
0x1453   :  { %1445 = vrot.lane.b32.xlu0 %v2277_v37, %s1832_s30 }
0x14a3   :  { %v1440_v18 = vpop.permute.xlu2 %1439 }
0x14a4   :  { %1443 = vst.msk [vmem:[#allocation10 + $0x8] sm:$0xff] %vm108_vm0, %v1440_v18 }
0x14a5   :  { %1469 = dma.vmem_to_hbm [thread:$0]  %s1462_s23, 256, %s1464_s6, [#allocation6], %s1826_s18, %s1826_s18, %s1827_s19  }
0x14ab   :  { %v1451_v38 = vpop.permute.xlu2 %1450 }
0x14ac   :  { %1454 = vst.msk [vmem:[#allocation11 + $0x8] sm:$0xff] %vm108_vm0, %v1451_v38 }
0x14bd   :  { %v1405_v40 = vpop.permute.xlu0 %1404 }
0x14be   :  { %v1407_v42 = vsel %vm108_vm0, %v1405_v40, 0.0 }
0x14bf   :  { %1408 = vadd.xlane.f32.xlu1 %v1407_v42 }
0x14c5   :  { %v1446_v19 = vpop.permute.xlu0 %1445 }
0x14c6   :  { %1448 = vst.msk [vmem:[#allocation11] sm:$0xff] %vm108_vm0, %v1446_v19 }
0x14c7   :  { %1482 = dma.vmem_to_hbm [thread:$0]  %s1475_s17, 256, %s1477_s21, [#allocation12], %s1826_s18, %s1826_s18, %s1827_s19  }
0x1532   :  { %v1409_v11 = vpop.xlane.xlu1 %1408 }
0x1533   :  { %v1414_v21 = vadd.f32 %v1559_v20, %v1409_v11 }
0x1535   :  { %v1545_v22 = vmul.f32 -1.442695, %v1414_v21 }
0x1537   :  { %1688 = vpow2.f32 %v1545_v22 }
0x153d   :  { %v1689_v57 = vpop.eup %1688 }
0x153e   :  { %v1418_v23 = vadd.f32 1.0, %v1689_v57 }
0x1540   :  { %1690 = vrcp.f32 %v1418_v23  ;;  %v1430_v27 = vand.u32 2147483648, %v1418_v23  ;;  %v1428_v29 = vand.u32 2147483647, %v1418_v23  ;;  %vm1424_vm5 = vweird.f32 %v1418_v23 }
0x1542   :  { %v1431_v31 = vor.u32 1.1754944e-38, %v1430_v27  ;;  %vm1429_vm8 = vcmp.eq.f32.partialorder %v1428_v29, 8.507059e+37 }
0x1546   :  { %v1691_v24 = vpop.eup %1690 }
0x1547   :  { %v1420_v25 = vmul.f32 %v1691_v24, %v1418_v23  ;;  %vm1425_vm0 = vweird.f32 %v1691_v24 }
0x1548   :  { %vm1426_vm7 = vmor %vm1424_vm5, %vm1425_vm0 }
0x1549   :  { %v1421_v26 = vsub.f32 1.0, %v1420_v25 }
0x154b   :  { %v1422_v28 = vmul.f32 %v1691_v24, %v1421_v26 }
0x154d   :  { %v1423_v30 = vadd.f32 %v1691_v24, %v1422_v28 }
0x154f   :  { %v1427_v32 = vsel %vm1426_vm7, %v1691_v24, %v1423_v30 }
0x1550   :  { %v1432_v33 = vsel %vm1429_vm8, %v1431_v31, %v1427_v32 }
0x1551   :  { %1435 = vst.msk [vmem:[%s2329_s11] sm:$0xff] %vm1434_vm6, %v1432_v33 }
0x1552   :  { %1821 = dma.done.wait [#allocation6], 256  }
0x1553   :  { %1822 = vsyncadd [#allocation6], 4294967040 }
0x1554   :  { %1823 = dma.done.wait [#allocation12], 256  }
0x1555   :  { %1824 = vsyncadd [#allocation12], 4294967040 }
0x1556   :  { %1493 = vsyncpa [#allocation5], 1 }
0x1557   :  { %1494 = vsyncpa [#allocation8], 1 }
0x1558   :  { %1495 = vsyncpa [#allocation6], 1 }
0x1559   :  { %1496 = vsyncpa [#allocation12], 1 }

</bundles_post_ra>
